<compile_context>
chip_gen: v6e
topology: v6e:2x2x1
jax: 0.10.0
libtpu: 0.0.40
codegen_flags: <defaults>
</compile_context>

<pallas_src>
import functools
import math

import jax
import jax.numpy as jnp
from jax.experimental import pallas as pl
from jax.experimental.pallas import tpu as pltpu


def _linformer_kernel(x_ref, ckv_ref, w_qkv_ref, w_o_ref, b_qkv_ref, b_o_ref,
                      *out_refs, num_heads, head_dim, need_weights):
    out_ref = out_refs[0]
    aw_ref = out_refs[1] if need_weights else None

    Bt, T, E = x_ref.shape
    C = ckv_ref.shape[0] // 2
    H = num_heads
    hd = head_dim
    cdt = x_ref.dtype                       # MXU compute dtype (bf16 or f32)

    x = x_ref[...]                          # (Bt, T, E), cdt
    x2 = x.reshape(Bt * T, E)               # leading-dim merge (layout-free)

    w_qkv = w_qkv_ref[...]                  # (3, H, E, hd) cdt  (q weights pre-scaled)
    w_o = w_o_ref[...]                      # (H, hd, E)    cdt
    b_qkv = b_qkv_ref[...]                  # (3, H, hd)    f32  (q bias pre-scaled)
    b_o = b_o_ref[...]                      # (1, E)        f32

    # --- Linformer sequence compression: one (2C, T) @ (T, E) per batch elem.
    ckv = ckv_ref[...]                      # (2C, T)
    k_parts, v_parts = [], []
    for b in range(Bt):                     # Bt is small & static -> unrolled
        kv_b = jnp.dot(ckv, x[b], preferred_element_type=jnp.float32)   # (2C, E)
        k_parts.append(kv_b[:C])            # sublane row split (free)
        v_parts.append(kv_b[C:])
    k_in = jnp.concatenate(k_parts, axis=0).astype(cdt)   # (Bt*C, E)
    v_in = jnp.concatenate(v_parts, axis=0).astype(cdt)   # (Bt*C, E)

    # --- projections + per-head scores.  Heads are pre-split in the weight
    #     stacks, so there is no lane slicing of activations in the kernel.
    score_rows = []                         # per head: (Bt*T, C) f32
    v_heads = []                            # per head: (Bt, C, hd) f32
    for h in range(H):
        q_h = jnp.dot(x2, w_qkv[0, h], preferred_element_type=jnp.float32) + b_qkv[0, h]
        k_h = jnp.dot(k_in, w_qkv[1, h], preferred_element_type=jnp.float32) + b_qkv[1, h]
        v_h = jnp.dot(v_in, w_qkv[2, h], preferred_element_type=jnp.float32) + b_qkv[2, h]
        s_h = jax.lax.dot_general(          # batched q @ k^T -> (Bt, T, C)
            q_h.reshape(Bt, T, hd), k_h.reshape(Bt, C, hd),
            (((2,), (2,)), ((0,), (0,))), preferred_element_type=jnp.float32)
        score_rows.append(s_h.reshape(Bt * T, C))
        v_heads.append(v_h.reshape(Bt, C, hd))

    # --- single softmax over the sublane-stacked (H*Bt*T, C) slab.
    s_all = jnp.concatenate(score_rows, axis=0)
    s_all = s_all - jnp.max(s_all, axis=-1, keepdims=True)
    p_all = jnp.exp(s_all)
    denom = jnp.sum(p_all, axis=-1, keepdims=True)
    p_all = p_all * pl.reciprocal(denom, approx=True)      # (H*Bt*T, C)

    # --- attention + accumulate-into-output projection (no head concat).
    rows = Bt * T
    out = jnp.zeros((rows, E), jnp.float32) + b_o           # (Bt*T, E)
    for h in range(H):
        p_h = p_all[h * rows:(h + 1) * rows].reshape(Bt, T, C)
        attn_h = jax.lax.dot_general(        # batched p @ v -> (Bt, T, hd)
            p_h, v_heads[h],
            (((2,), (1,)), ((0,), (0,))), preferred_element_type=jnp.float32)
        out = out + jnp.dot(attn_h.reshape(rows, hd), w_o[h],
                            preferred_element_type=jnp.float32)
    out_ref[...] = out.reshape(Bt, T, E).astype(out_ref.dtype)

    if need_weights:
        # mean over heads; the 1/H is folded into one multiply on the reduced slab.
        aw = jnp.sum(p_all.reshape(H, rows, C), axis=0) * (1.0 / H)
        aw_ref[...] = aw.reshape(Bt, T, C).astype(aw_ref.dtype)


def _pick_block_batch(batch, seq_len, target_rows=256):
    """Pick the batch block: smallest divisor of `batch` whose block gives
    >= target_rows MXU rows per grid step (keeps as many 'parallel' grid steps
    as possible for v7x megacore); if unreachable, keep >= 2 grid steps."""
    divisors = [d for d in range(1, batch + 1) if batch % d == 0]
    good = [d for d in divisors if d * seq_len >= target_rows]
    if good:
        return min(good)
    two_step = [d for d in divisors if batch // d >= 2]
    return max(two_step) if two_step else batch


def linformer_attention_pallas(query_tbe, params, num_heads, *,
                               need_weights=True,
                               compute_dtype=jnp.bfloat16,
                               block_b=None):
    """query_tbe: (T, B, E) (Time x Batch x Channel), like the PyTorch module.

    Returns (attn (T, B, E) f32, attn_weights_mean (B, T, C) f32 or None).
    """
    T, B, E = query_tbe.shape
    H = num_heads
    hd = E // H
    assert hd * H == E, "embed_dim must be divisible by num_heads"
    scaling = hd ** (-0.5)
    C = params["compress_k"].shape[0]
    cdt = compute_dtype

    if block_b is None:
        block_b = _pick_block_batch(B, T)
    assert B % block_b == 0, "block_b must divide the batch size"

    # --- host-side (free) parameter packing --------------------------------
    x = jnp.transpose(query_tbe, (1, 0, 2)).astype(cdt)             # (B, T, E)
    ckv = jnp.concatenate([params["compress_k"][:, :T],
                           params["compress_v"][:, :T]], axis=0).astype(cdt)  # (2C, T)

    def per_head(w):        # nn.Linear weight (E_out, E_in) -> (H, E_in, hd)
        return jnp.transpose(w.T.reshape(E, H, hd), (1, 0, 2))

    w_qkv = jnp.stack([per_head(params["q_w"]) * scaling,           # scaling folded
                       per_head(params["k_w"]),
                       per_head(params["v_w"])], axis=0).astype(cdt)  # (3, H, E, hd)
    w_o = params["out_w"].T.reshape(H, hd, E).astype(cdt)             # (H, hd, E)
    b_qkv = jnp.stack([params["q_b"] * scaling,
                       params["k_b"],
                       params["v_b"]], axis=0).reshape(3, H, hd).astype(jnp.float32)
    b_o = params["out_b"].reshape(1, E).astype(jnp.float32)

    kernel = functools.partial(_linformer_kernel, num_heads=H, head_dim=hd,
                               need_weights=need_weights)

    def fixed(shape):       # grid-constant operand: same block every step
        return pl.BlockSpec(shape, lambda i, n=len(shape): (0,) * n)

    in_specs = [
        pl.BlockSpec((block_b, T, E), lambda i: (i, 0, 0)),   # x (batch-blocked)
        fixed((2 * C, T)),                                    # stacked compress_k|v
        fixed((3, H, E, hd)),                                 # stacked per-head q/k/v weights
        fixed((H, hd, E)),                                    # per-head out-proj weights
        fixed((3, H, hd)),                                    # stacked q/k/v biases
        fixed((1, E)),                                        # out-proj bias
    ]
    out_shapes = [jax.ShapeDtypeStruct((B, T, E), jnp.float32)]
    out_specs = [pl.BlockSpec((block_b, T, E), lambda i: (i, 0, 0))]
    if need_weights:
        out_shapes.append(jax.ShapeDtypeStruct((B, T, C), jnp.float32))
        out_specs.append(pl.BlockSpec((block_b, T, C), lambda i: (i, 0, 0)))

    results = pl.pallas_call(
        kernel,
        out_shape=tuple(out_shapes),
        grid_spec=pltpu.PrefetchScalarGridSpec(
            num_scalar_prefetch=0,
            grid=(B // block_b,),
            in_specs=in_specs,
            out_specs=tuple(out_specs)),
        compiler_params=pltpu.CompilerParams(
            dimension_semantics=("parallel",)),
        # For large-E configs on v7x (64 MiB VMEM), additionally single-buffer
        # the grid-constant weight operands and set vmem_limit_bytes here.
    )(x, ckv, w_qkv, w_o, b_qkv, b_o)

    if need_weights:
        out, aw = results
    else:
        out = results[0] if isinstance(results, (tuple, list)) else results
        aw = None
    return jnp.transpose(out, (1, 0, 2)), aw                         # (T, B, E), (B, T, C)


def linformer_attention_ref(query, params, num_heads):
    """Pure-JAX reference mirroring the PyTorch forward (self_attention path)."""
    T, B, E = query.shape
    hd = E // num_heads
    scaling = hd ** (-0.5)

    q = query @ params["q_w"].T + params["q_b"]                      # (T, B, E)
    k_in = jnp.einsum("ct,tbe->cbe", params["compress_k"][:, :T], query)
    v_in = jnp.einsum("ct,tbe->cbe", params["compress_v"][:, :T], query)
    k = k_in @ params["k_w"].T + params["k_b"]                       # (C, B, E)
    v = v_in @ params["v_w"].T + params["v_b"]
    q = q * scaling

    q = q.reshape(T, B * num_heads, hd).transpose(1, 0, 2)           # (B*H, T, hd)
    k = k.reshape(-1, B * num_heads, hd).transpose(1, 0, 2)          # (B*H, C, hd)
    v = v.reshape(-1, B * num_heads, hd).transpose(1, 0, 2)

    aw = jax.nn.softmax(jnp.einsum("bth,bch->btc", q, k), axis=-1)   # (B*H, T, C)
    attn = jnp.einsum("btc,bch->bth", aw, v)                         # (B*H, T, hd)
    attn = attn.transpose(1, 0, 2).reshape(T, B, E)
    out = attn @ params["out_w"].T + params["out_b"]
    aw_mean = aw.reshape(B, num_heads, T, -1).mean(axis=1)           # (B, T, C)
    return out, aw_mean


def init_params(key, embed_dim, max_seq_len, compressed):
    """Deterministic parameter init (xavier-uniform weights, small uniform biases)."""
    C = max_seq_len // compressed
    ks = jax.random.split(key, 12)

    def xavier(k, shape):
        fan_out, fan_in = shape
        bound = math.sqrt(6.0 / (fan_in + fan_out))
        return jax.random.uniform(k, shape, jnp.float32, -bound, bound)

    def bias(k, fan_in, n):
        bound = 1.0 / math.sqrt(fan_in)
        return jax.random.uniform(k, (n,), jnp.float32, -bound, bound)

    return {
        "q_w": xavier(ks[0], (embed_dim, embed_dim)),
        "q_b": bias(ks[1], embed_dim, embed_dim),
        "k_w": xavier(ks[2], (embed_dim, embed_dim)),
        "k_b": bias(ks[3], embed_dim, embed_dim),
        "v_w": xavier(ks[4], (embed_dim, embed_dim)),
        "v_b": bias(ks[5], embed_dim, embed_dim),
        "out_w": xavier(ks[6], (embed_dim, embed_dim)),
        "out_b": bias(ks[7], embed_dim, embed_dim),
        "compress_k": xavier(ks[8], (C, max_seq_len)),
        "compress_v": xavier(ks[9], (C, max_seq_len)),
    }


if __name__ == "__main__":
    # Small Linformer config: embed_dim=32, heads=4, max_seq_len=64, compressed=2 -> C=32.
    T, B, E = 16, 4, 32
    num_heads = 4
    max_seq_len = 64
    compressed = 2

    key = jax.random.PRNGKey(0)
    k_param, k_x = jax.random.split(key)
    params = init_params(k_param, E, max_seq_len, compressed)
    query = jax.random.normal(k_x, (T, B, E), jnp.float32)           # Time x Batch x Channel

    attn_ref, aw_ref_ = linformer_attention_ref(query, params, num_heads)

    # f32 MXU-input path: tight structural check.
    attn32, aw32 = linformer_attention_pallas(query, params, num_heads,
                                              compute_dtype=jnp.float32)
    jax.block_until_ready((attn32, aw32))
    assert attn32.shape == (T, B, E)
    assert aw32.shape == (B, T, max_seq_len // compressed)
    assert jnp.allclose(attn32, attn_ref, atol=5e-3, rtol=5e-3), "attn mismatch (f32)"
    assert jnp.allclose(aw32, aw_ref_, atol=5e-3, rtol=5e-3), "attn_weights mismatch (f32)"

    # Default bf16 MXU-input path (per perf review); looser tolerance.
    attn_bf, aw_bf = linformer_attention_pallas(query, params, num_heads)
    jax.block_until_ready((attn_bf, aw_bf))
    assert jnp.allclose(attn_bf, attn_ref, atol=5e-2, rtol=5e-2), "attn mismatch (bf16)"
    assert jnp.allclose(aw_bf, aw_ref_, atol=5e-2, rtol=5e-2), "attn_weights mismatch (bf16)"

    # need_weights=False path: skips the attention-weights compute + writeback.
    attn_nw, aw_nw = linformer_attention_pallas(query, params, num_heads,
                                                need_weights=False)
    jax.block_until_ready(attn_nw)
    assert aw_nw is None
    assert jnp.allclose(attn_nw, attn_ref, atol=5e-2, rtol=5e-2), "attn mismatch (no-weights)"

    print("KERNEL_OK")
</pallas_src>

<mosaic_0001>
module attributes {stable_mosaic.version = 11 : i64} {
  func.func @_linformer_kernel(%arg0: i32, %arg1: memref<2x16x32xf32, #tpu.memory_space<vmem>>, %arg2: memref<64x16xf32, #tpu.memory_space<vmem>>, %arg3: memref<3x4x32x8xf32, #tpu.memory_space<vmem>>, %arg4: memref<4x8x32xf32, #tpu.memory_space<vmem>>, %arg5: memref<3x4x8xf32, #tpu.memory_space<vmem>>, %arg6: memref<1x32xf32, #tpu.memory_space<vmem>>, %arg7: memref<2x16x32xf32, #tpu.memory_space<vmem>>, %arg8: memref<2x16x32xf32, #tpu.memory_space<vmem>>) attributes {dimension_semantics = [#tpu.dimension_semantics<parallel>], iteration_bounds = array<i64: 2>, scalar_prefetch = 0 : i64, scratch_operands = 0 : i64, tpu.core_type = #tpu.core_type<tc>, window_params = [{transform_indices = @transform_0, window_bounds = array<i64: 2, 16, 32>}, {pipeline_mode = #tpu.pipeline_mode<synchronous>, transform_indices = @transform_1, window_bounds = array<i64: 64, 16>}, {pipeline_mode = #tpu.pipeline_mode<synchronous>, transform_indices = @transform_2, window_bounds = array<i64: 3, 4, 32, 8>}, {pipeline_mode = #tpu.pipeline_mode<synchronous>, transform_indices = @transform_3, window_bounds = array<i64: 4, 8, 32>}, {pipeline_mode = #tpu.pipeline_mode<synchronous>, transform_indices = @transform_4, window_bounds = array<i64: 3, 4, 8>}, {pipeline_mode = #tpu.pipeline_mode<synchronous>, transform_indices = @transform_5, window_bounds = array<i64: 1, 32>}, {transform_indices = @transform_6, window_bounds = array<i64: 2, 16, 32>}, {transform_indices = @transform_7, window_bounds = array<i64: 2, 16, 32>}]} {
    %c0 = arith.constant 0 : index
    %c0_0 = arith.constant 0 : index
    %c0_1 = arith.constant 0 : index
    %0 = vector.load %arg1[%c0, %c0_0, %c0_1] : memref<2x16x32xf32, #tpu.memory_space<vmem>>, vector<2x16x32xf32>
    %1 = vector.shape_cast %0 : vector<2x16x32xf32> to vector<32x32xf32>
    %c0_2 = arith.constant 0 : index
    %c0_3 = arith.constant 0 : index
    %c0_4 = arith.constant 0 : index
    %c0_5 = arith.constant 0 : index
    %2 = vector.load %arg3[%c0_2, %c0_3, %c0_4, %c0_5] : memref<3x4x32x8xf32, #tpu.memory_space<vmem>>, vector<3x4x32x8xf32>
    %c0_6 = arith.constant 0 : index
    %c0_7 = arith.constant 0 : index
    %c0_8 = arith.constant 0 : index
    %3 = vector.load %arg4[%c0_6, %c0_7, %c0_8] : memref<4x8x32xf32, #tpu.memory_space<vmem>>, vector<4x8x32xf32>
    %c0_9 = arith.constant 0 : index
    %c0_10 = arith.constant 0 : index
    %c0_11 = arith.constant 0 : index
    %4 = vector.load %arg5[%c0_9, %c0_10, %c0_11] : memref<3x4x8xf32, #tpu.memory_space<vmem>>, vector<3x4x8xf32>
    %c0_12 = arith.constant 0 : index
    %c0_13 = arith.constant 0 : index
    %5 = vector.load %arg6[%c0_12, %c0_13] : memref<1x32xf32, #tpu.memory_space<vmem>>, vector<1x32xf32>
    %c0_14 = arith.constant 0 : index
    %c0_15 = arith.constant 0 : index
    %6 = vector.load %arg2[%c0_14, %c0_15] : memref<64x16xf32, #tpu.memory_space<vmem>>, vector<64x16xf32>
    %7 = vector.extract_strided_slice %0 {offsets = [0, 0, 0], sizes = [1, 16, 32], strides = [1, 1, 1]} : vector<2x16x32xf32> to vector<1x16x32xf32>
    %8 = vector.shape_cast %7 : vector<1x16x32xf32> to vector<16x32xf32>
    %cst = arith.constant dense<0.000000e+00> : vector<64x32xf32>
    %9 = tpu.matmul %6, %8, %cst {dimension_numbers = #tpu.dot_dimension_numbers<[1], [0], [0], [1], [0, 0, 1, 1], [], []>} : vector<64x16xf32>, vector<16x32xf32>, vector<64x32xf32> -> vector<64x32xf32>
    %10 = vector.extract_strided_slice %9 {offsets = [0, 0], sizes = [32, 32], strides = [1, 1]} : vector<64x32xf32> to vector<32x32xf32>
    %11 = vector.extract_strided_slice %9 {offsets = [32, 0], sizes = [32, 32], strides = [1, 1]} : vector<64x32xf32> to vector<32x32xf32>
    %12 = vector.extract_strided_slice %0 {offsets = [1, 0, 0], sizes = [1, 16, 32], strides = [1, 1, 1]} : vector<2x16x32xf32> to vector<1x16x32xf32>
    %13 = vector.shape_cast %12 : vector<1x16x32xf32> to vector<16x32xf32>
    %cst_16 = arith.constant dense<0.000000e+00> : vector<64x32xf32>
    %14 = tpu.matmul %6, %13, %cst_16 {dimension_numbers = #tpu.dot_dimension_numbers<[1], [0], [0], [1], [0, 0, 1, 1], [], []>} : vector<64x16xf32>, vector<16x32xf32>, vector<64x32xf32> -> vector<64x32xf32>
    %15 = vector.extract_strided_slice %14 {offsets = [0, 0], sizes = [32, 32], strides = [1, 1]} : vector<64x32xf32> to vector<32x32xf32>
    %16 = vector.extract_strided_slice %14 {offsets = [32, 0], sizes = [32, 32], strides = [1, 1]} : vector<64x32xf32> to vector<32x32xf32>
    %17 = tpu.concatenate %10, %15 in 0 : vector<32x32xf32>, vector<32x32xf32> -> vector<64x32xf32>
    %18 = tpu.concatenate %11, %16 in 0 : vector<32x32xf32>, vector<32x32xf32> -> vector<64x32xf32>
    %19 = vector.extract_strided_slice %2 {offsets = [0, 0, 0, 0], sizes = [1, 1, 32, 8], strides = [1, 1, 1, 1]} : vector<3x4x32x8xf32> to vector<1x1x32x8xf32>
    %20 = vector.shape_cast %19 : vector<1x1x32x8xf32> to vector<32x8xf32>
    %cst_17 = arith.constant dense<0.000000e+00> : vector<32x8xf32>
    %21 = tpu.matmul %1, %20, %cst_17 {dimension_numbers = #tpu.dot_dimension_numbers<[1], [0], [0], [1], [0, 0, 1, 1], [], []>} : vector<32x32xf32>, vector<32x8xf32>, vector<32x8xf32> -> vector<32x8xf32>
    %22 = vector.extract_strided_slice %4 {offsets = [0, 0, 0], sizes = [1, 1, 8], strides = [1, 1, 1]} : vector<3x4x8xf32> to vector<1x1x8xf32>
    %23 = vector.shape_cast %22 : vector<1x1x8xf32> to vector<8xf32>
    %24 = vector.shape_cast %23 : vector<8xf32> to vector<1x8xf32>
    %25 = vector.broadcast %24 : vector<1x8xf32> to vector<32x8xf32>
    %26 = arith.addf %21, %25 : vector<32x8xf32>
    %27 = vector.extract_strided_slice %2 {offsets = [1, 0, 0, 0], sizes = [1, 1, 32, 8], strides = [1, 1, 1, 1]} : vector<3x4x32x8xf32> to vector<1x1x32x8xf32>
    %28 = vector.shape_cast %27 : vector<1x1x32x8xf32> to vector<32x8xf32>
    %cst_18 = arith.constant dense<0.000000e+00> : vector<64x8xf32>
    %29 = tpu.matmul %17, %28, %cst_18 {dimension_numbers = #tpu.dot_dimension_numbers<[1], [0], [0], [1], [0, 0, 1, 1], [], []>} : vector<64x32xf32>, vector<32x8xf32>, vector<64x8xf32> -> vector<64x8xf32>
    %30 = vector.extract_strided_slice %4 {offsets = [1, 0, 0], sizes = [1, 1, 8], strides = [1, 1, 1]} : vector<3x4x8xf32> to vector<1x1x8xf32>
    %31 = vector.shape_cast %30 : vector<1x1x8xf32> to vector<8xf32>
    %32 = vector.shape_cast %31 : vector<8xf32> to vector<1x8xf32>
    %33 = vector.broadcast %32 : vector<1x8xf32> to vector<64x8xf32>
    %34 = arith.addf %29, %33 : vector<64x8xf32>
    %35 = vector.extract_strided_slice %2 {offsets = [2, 0, 0, 0], sizes = [1, 1, 32, 8], strides = [1, 1, 1, 1]} : vector<3x4x32x8xf32> to vector<1x1x32x8xf32>
    %36 = vector.shape_cast %35 : vector<1x1x32x8xf32> to vector<32x8xf32>
    %cst_19 = arith.constant dense<0.000000e+00> : vector<64x8xf32>
    %37 = tpu.matmul %18, %36, %cst_19 {dimension_numbers = #tpu.dot_dimension_numbers<[1], [0], [0], [1], [0, 0, 1, 1], [], []>} : vector<64x32xf32>, vector<32x8xf32>, vector<64x8xf32> -> vector<64x8xf32>
    %38 = vector.extract_strided_slice %4 {offsets = [2, 0, 0], sizes = [1, 1, 8], strides = [1, 1, 1]} : vector<3x4x8xf32> to vector<1x1x8xf32>
    %39 = vector.shape_cast %38 : vector<1x1x8xf32> to vector<8xf32>
    %40 = vector.shape_cast %39 : vector<8xf32> to vector<1x8xf32>
    %41 = vector.broadcast %40 : vector<1x8xf32> to vector<64x8xf32>
    %42 = arith.addf %37, %41 : vector<64x8xf32>
    %43 = vector.shape_cast %26 : vector<32x8xf32> to vector<2x16x8xf32>
    %44 = vector.shape_cast %34 : vector<64x8xf32> to vector<2x32x8xf32>
    %cst_20 = arith.constant dense<0.000000e+00> : vector<2x16x32xf32>
    %45 = tpu.matmul %43, %44, %cst_20 {dimension_numbers = #tpu.dot_dimension_numbers<[2], [2], [1], [1], [0, 0, 0, 1, 1, 1], [0], [0]>} : vector<2x16x8xf32>, vector<2x32x8xf32>, vector<2x16x32xf32> -> vector<2x16x32xf32>
    %46 = vector.shape_cast %45 : vector<2x16x32xf32> to vector<32x32xf32>
    %47 = vector.shape_cast %42 : vector<64x8xf32> to vector<2x32x8xf32>
    %48 = vector.extract_strided_slice %2 {offsets = [0, 1, 0, 0], sizes = [1, 1, 32, 8], strides = [1, 1, 1, 1]} : vector<3x4x32x8xf32> to vector<1x1x32x8xf32>
    %49 = vector.shape_cast %48 : vector<1x1x32x8xf32> to vector<32x8xf32>
    %cst_21 = arith.constant dense<0.000000e+00> : vector<32x8xf32>
    %50 = tpu.matmul %1, %49, %cst_21 {dimension_numbers = #tpu.dot_dimension_numbers<[1], [0], [0], [1], [0, 0, 1, 1], [], []>} : vector<32x32xf32>, vector<32x8xf32>, vector<32x8xf32> -> vector<32x8xf32>
    %51 = vector.extract_strided_slice %4 {offsets = [0, 1, 0], sizes = [1, 1, 8], strides = [1, 1, 1]} : vector<3x4x8xf32> to vector<1x1x8xf32>
    %52 = vector.shape_cast %51 : vector<1x1x8xf32> to vector<8xf32>
    %53 = vector.shape_cast %52 : vector<8xf32> to vector<1x8xf32>
    %54 = vector.broadcast %53 : vector<1x8xf32> to vector<32x8xf32>
    %55 = arith.addf %50, %54 : vector<32x8xf32>
    %56 = vector.extract_strided_slice %2 {offsets = [1, 1, 0, 0], sizes = [1, 1, 32, 8], strides = [1, 1, 1, 1]} : vector<3x4x32x8xf32> to vector<1x1x32x8xf32>
    %57 = vector.shape_cast %56 : vector<1x1x32x8xf32> to vector<32x8xf32>
    %cst_22 = arith.constant dense<0.000000e+00> : vector<64x8xf32>
    %58 = tpu.matmul %17, %57, %cst_22 {dimension_numbers = #tpu.dot_dimension_numbers<[1], [0], [0], [1], [0, 0, 1, 1], [], []>} : vector<64x32xf32>, vector<32x8xf32>, vector<64x8xf32> -> vector<64x8xf32>
    %59 = vector.extract_strided_slice %4 {offsets = [1, 1, 0], sizes = [1, 1, 8], strides = [1, 1, 1]} : vector<3x4x8xf32> to vector<1x1x8xf32>
    %60 = vector.shape_cast %59 : vector<1x1x8xf32> to vector<8xf32>
    %61 = vector.shape_cast %60 : vector<8xf32> to vector<1x8xf32>
    %62 = vector.broadcast %61 : vector<1x8xf32> to vector<64x8xf32>
    %63 = arith.addf %58, %62 : vector<64x8xf32>
    %64 = vector.extract_strided_slice %2 {offsets = [2, 1, 0, 0], sizes = [1, 1, 32, 8], strides = [1, 1, 1, 1]} : vector<3x4x32x8xf32> to vector<1x1x32x8xf32>
    %65 = vector.shape_cast %64 : vector<1x1x32x8xf32> to vector<32x8xf32>
    %cst_23 = arith.constant dense<0.000000e+00> : vector<64x8xf32>
    %66 = tpu.matmul %18, %65, %cst_23 {dimension_numbers = #tpu.dot_dimension_numbers<[1], [0], [0], [1], [0, 0, 1, 1], [], []>} : vector<64x32xf32>, vector<32x8xf32>, vector<64x8xf32> -> vector<64x8xf32>
    %67 = vector.extract_strided_slice %4 {offsets = [2, 1, 0], sizes = [1, 1, 8], strides = [1, 1, 1]} : vector<3x4x8xf32> to vector<1x1x8xf32>
    %68 = vector.shape_cast %67 : vector<1x1x8xf32> to vector<8xf32>
    %69 = vector.shape_cast %68 : vector<8xf32> to vector<1x8xf32>
    %70 = vector.broadcast %69 : vector<1x8xf32> to vector<64x8xf32>
    %71 = arith.addf %66, %70 : vector<64x8xf32>
    %72 = vector.shape_cast %55 : vector<32x8xf32> to vector<2x16x8xf32>
    %73 = vector.shape_cast %63 : vector<64x8xf32> to vector<2x32x8xf32>
    %cst_24 = arith.constant dense<0.000000e+00> : vector<2x16x32xf32>
    %74 = tpu.matmul %72, %73, %cst_24 {dimension_numbers = #tpu.dot_dimension_numbers<[2], [2], [1], [1], [0, 0, 0, 1, 1, 1], [0], [0]>} : vector<2x16x8xf32>, vector<2x32x8xf32>, vector<2x16x32xf32> -> vector<2x16x32xf32>
    %75 = vector.shape_cast %74 : vector<2x16x32xf32> to vector<32x32xf32>
    %76 = vector.shape_cast %71 : vector<64x8xf32> to vector<2x32x8xf32>
    %77 = vector.extract_strided_slice %2 {offsets = [0, 2, 0, 0], sizes = [1, 1, 32, 8], strides = [1, 1, 1, 1]} : vector<3x4x32x8xf32> to vector<1x1x32x8xf32>
    %78 = vector.shape_cast %77 : vector<1x1x32x8xf32> to vector<32x8xf32>
    %cst_25 = arith.constant dense<0.000000e+00> : vector<32x8xf32>
    %79 = tpu.matmul %1, %78, %cst_25 {dimension_numbers = #tpu.dot_dimension_numbers<[1], [0], [0], [1], [0, 0, 1, 1], [], []>} : vector<32x32xf32>, vector<32x8xf32>, vector<32x8xf32> -> vector<32x8xf32>
    %80 = vector.extract_strided_slice %4 {offsets = [0, 2, 0], sizes = [1, 1, 8], strides = [1, 1, 1]} : vector<3x4x8xf32> to vector<1x1x8xf32>
    %81 = vector.shape_cast %80 : vector<1x1x8xf32> to vector<8xf32>
    %82 = vector.shape_cast %81 : vector<8xf32> to vector<1x8xf32>
    %83 = vector.broadcast %82 : vector<1x8xf32> to vector<32x8xf32>
    %84 = arith.addf %79, %83 : vector<32x8xf32>
    %85 = vector.extract_strided_slice %2 {offsets = [1, 2, 0, 0], sizes = [1, 1, 32, 8], strides = [1, 1, 1, 1]} : vector<3x4x32x8xf32> to vector<1x1x32x8xf32>
    %86 = vector.shape_cast %85 : vector<1x1x32x8xf32> to vector<32x8xf32>
    %cst_26 = arith.constant dense<0.000000e+00> : vector<64x8xf32>
    %87 = tpu.matmul %17, %86, %cst_26 {dimension_numbers = #tpu.dot_dimension_numbers<[1], [0], [0], [1], [0, 0, 1, 1], [], []>} : vector<64x32xf32>, vector<32x8xf32>, vector<64x8xf32> -> vector<64x8xf32>
    %88 = vector.extract_strided_slice %4 {offsets = [1, 2, 0], sizes = [1, 1, 8], strides = [1, 1, 1]} : vector<3x4x8xf32> to vector<1x1x8xf32>
    %89 = vector.shape_cast %88 : vector<1x1x8xf32> to vector<8xf32>
    %90 = vector.shape_cast %89 : vector<8xf32> to vector<1x8xf32>
    %91 = vector.broadcast %90 : vector<1x8xf32> to vector<64x8xf32>
    %92 = arith.addf %87, %91 : vector<64x8xf32>
    %93 = vector.extract_strided_slice %2 {offsets = [2, 2, 0, 0], sizes = [1, 1, 32, 8], strides = [1, 1, 1, 1]} : vector<3x4x32x8xf32> to vector<1x1x32x8xf32>
    %94 = vector.shape_cast %93 : vector<1x1x32x8xf32> to vector<32x8xf32>
    %cst_27 = arith.constant dense<0.000000e+00> : vector<64x8xf32>
    %95 = tpu.matmul %18, %94, %cst_27 {dimension_numbers = #tpu.dot_dimension_numbers<[1], [0], [0], [1], [0, 0, 1, 1], [], []>} : vector<64x32xf32>, vector<32x8xf32>, vector<64x8xf32> -> vector<64x8xf32>
    %96 = vector.extract_strided_slice %4 {offsets = [2, 2, 0], sizes = [1, 1, 8], strides = [1, 1, 1]} : vector<3x4x8xf32> to vector<1x1x8xf32>
    %97 = vector.shape_cast %96 : vector<1x1x8xf32> to vector<8xf32>
    %98 = vector.shape_cast %97 : vector<8xf32> to vector<1x8xf32>
    %99 = vector.broadcast %98 : vector<1x8xf32> to vector<64x8xf32>
    %100 = arith.addf %95, %99 : vector<64x8xf32>
    %101 = vector.shape_cast %84 : vector<32x8xf32> to vector<2x16x8xf32>
    %102 = vector.shape_cast %92 : vector<64x8xf32> to vector<2x32x8xf32>
    %cst_28 = arith.constant dense<0.000000e+00> : vector<2x16x32xf32>
    %103 = tpu.matmul %101, %102, %cst_28 {dimension_numbers = #tpu.dot_dimension_numbers<[2], [2], [1], [1], [0, 0, 0, 1, 1, 1], [0], [0]>} : vector<2x16x8xf32>, vector<2x32x8xf32>, vector<2x16x32xf32> -> vector<2x16x32xf32>
    %104 = vector.shape_cast %103 : vector<2x16x32xf32> to vector<32x32xf32>
    %105 = vector.shape_cast %100 : vector<64x8xf32> to vector<2x32x8xf32>
    %106 = vector.extract_strided_slice %2 {offsets = [0, 3, 0, 0], sizes = [1, 1, 32, 8], strides = [1, 1, 1, 1]} : vector<3x4x32x8xf32> to vector<1x1x32x8xf32>
    %107 = vector.shape_cast %106 : vector<1x1x32x8xf32> to vector<32x8xf32>
    %cst_29 = arith.constant dense<0.000000e+00> : vector<32x8xf32>
    %108 = tpu.matmul %1, %107, %cst_29 {dimension_numbers = #tpu.dot_dimension_numbers<[1], [0], [0], [1], [0, 0, 1, 1], [], []>} : vector<32x32xf32>, vector<32x8xf32>, vector<32x8xf32> -> vector<32x8xf32>
    %109 = vector.extract_strided_slice %4 {offsets = [0, 3, 0], sizes = [1, 1, 8], strides = [1, 1, 1]} : vector<3x4x8xf32> to vector<1x1x8xf32>
    %110 = vector.shape_cast %109 : vector<1x1x8xf32> to vector<8xf32>
    %111 = vector.shape_cast %110 : vector<8xf32> to vector<1x8xf32>
    %112 = vector.broadcast %111 : vector<1x8xf32> to vector<32x8xf32>
    %113 = arith.addf %108, %112 : vector<32x8xf32>
    %114 = vector.extract_strided_slice %2 {offsets = [1, 3, 0, 0], sizes = [1, 1, 32, 8], strides = [1, 1, 1, 1]} : vector<3x4x32x8xf32> to vector<1x1x32x8xf32>
    %115 = vector.shape_cast %114 : vector<1x1x32x8xf32> to vector<32x8xf32>
    %cst_30 = arith.constant dense<0.000000e+00> : vector<64x8xf32>
    %116 = tpu.matmul %17, %115, %cst_30 {dimension_numbers = #tpu.dot_dimension_numbers<[1], [0], [0], [1], [0, 0, 1, 1], [], []>} : vector<64x32xf32>, vector<32x8xf32>, vector<64x8xf32> -> vector<64x8xf32>
    %117 = vector.extract_strided_slice %4 {offsets = [1, 3, 0], sizes = [1, 1, 8], strides = [1, 1, 1]} : vector<3x4x8xf32> to vector<1x1x8xf32>
    %118 = vector.shape_cast %117 : vector<1x1x8xf32> to vector<8xf32>
    %119 = vector.shape_cast %118 : vector<8xf32> to vector<1x8xf32>
    %120 = vector.broadcast %119 : vector<1x8xf32> to vector<64x8xf32>
    %121 = arith.addf %116, %120 : vector<64x8xf32>
    %122 = vector.extract_strided_slice %2 {offsets = [2, 3, 0, 0], sizes = [1, 1, 32, 8], strides = [1, 1, 1, 1]} : vector<3x4x32x8xf32> to vector<1x1x32x8xf32>
    %123 = vector.shape_cast %122 : vector<1x1x32x8xf32> to vector<32x8xf32>
    %cst_31 = arith.constant dense<0.000000e+00> : vector<64x8xf32>
    %124 = tpu.matmul %18, %123, %cst_31 {dimension_numbers = #tpu.dot_dimension_numbers<[1], [0], [0], [1], [0, 0, 1, 1], [], []>} : vector<64x32xf32>, vector<32x8xf32>, vector<64x8xf32> -> vector<64x8xf32>
    %125 = vector.extract_strided_slice %4 {offsets = [2, 3, 0], sizes = [1, 1, 8], strides = [1, 1, 1]} : vector<3x4x8xf32> to vector<1x1x8xf32>
    %126 = vector.shape_cast %125 : vector<1x1x8xf32> to vector<8xf32>
    %127 = vector.shape_cast %126 : vector<8xf32> to vector<1x8xf32>
    %128 = vector.broadcast %127 : vector<1x8xf32> to vector<64x8xf32>
    %129 = arith.addf %124, %128 : vector<64x8xf32>
    %130 = vector.shape_cast %113 : vector<32x8xf32> to vector<2x16x8xf32>
    %131 = vector.shape_cast %121 : vector<64x8xf32> to vector<2x32x8xf32>
    %cst_32 = arith.constant dense<0.000000e+00> : vector<2x16x32xf32>
    %132 = tpu.matmul %130, %131, %cst_32 {dimension_numbers = #tpu.dot_dimension_numbers<[2], [2], [1], [1], [0, 0, 0, 1, 1, 1], [0], [0]>} : vector<2x16x8xf32>, vector<2x32x8xf32>, vector<2x16x32xf32> -> vector<2x16x32xf32>
    %133 = vector.shape_cast %132 : vector<2x16x32xf32> to vector<32x32xf32>
    %134 = vector.shape_cast %129 : vector<64x8xf32> to vector<2x32x8xf32>
    %135 = tpu.concatenate %46, %75, %104, %133 in 0 : vector<32x32xf32>, vector<32x32xf32>, vector<32x32xf32>, vector<32x32xf32> -> vector<128x32xf32>
    %cst_33 = arith.constant dense<0xFF800000> : vector<128xf32>
    %136 = vector.multi_reduction <maximumf>, %135, %cst_33 [1] : vector<128x32xf32> to vector<128xf32>
    %137 = vector.shape_cast %136 : vector<128xf32> to vector<128x1xf32>
    %138 = vector.broadcast %137 : vector<128x1xf32> to vector<128x32xf32>
    %139 = arith.subf %135, %138 : vector<128x32xf32>
    %140 = math.exp %139 : vector<128x32xf32>
    %cst_34 = arith.constant dense<0.000000e+00> : vector<128xf32>
    %141 = vector.multi_reduction <add>, %140, %cst_34 [1] : vector<128x32xf32> to vector<128xf32>
    %142 = vector.shape_cast %141 : vector<128xf32> to vector<128x1xf32>
    %143 = tpu.reciprocal %142 {approx = true} : vector<128x1xf32> -> vector<128x1xf32>
    %144 = vector.broadcast %143 : vector<128x1xf32> to vector<128x32xf32>
    %145 = arith.mulf %140, %144 : vector<128x32xf32>
    %cst_35 = arith.constant 0.000000e+00 : f32
    %146 = vector.broadcast %cst_35 : f32 to vector<32x32xf32>
    %147 = vector.broadcast %5 : vector<1x32xf32> to vector<32x32xf32>
    %148 = arith.addf %146, %147 : vector<32x32xf32>
    %149 = vector.extract_strided_slice %145 {offsets = [0, 0], sizes = [32, 32], strides = [1, 1]} : vector<128x32xf32> to vector<32x32xf32>
    %150 = vector.shape_cast %149 : vector<32x32xf32> to vector<2x16x32xf32>
    %cst_36 = arith.constant dense<0.000000e+00> : vector<2x16x8xf32>
    %151 = tpu.matmul %150, %47, %cst_36 {dimension_numbers = #tpu.dot_dimension_numbers<[2], [1], [1], [2], [0, 0, 0, 1, 1, 2], [0], [0]>} : vector<2x16x32xf32>, vector<2x32x8xf32>, vector<2x16x8xf32> -> vector<2x16x8xf32>
    %152 = vector.shape_cast %151 : vector<2x16x8xf32> to vector<32x8xf32>
    %153 = vector.extract_strided_slice %3 {offsets = [0, 0, 0], sizes = [1, 8, 32], strides = [1, 1, 1]} : vector<4x8x32xf32> to vector<1x8x32xf32>
    %154 = vector.shape_cast %153 : vector<1x8x32xf32> to vector<8x32xf32>
    %cst_37 = arith.constant dense<0.000000e+00> : vector<32x32xf32>
    %155 = tpu.matmul %152, %154, %cst_37 {dimension_numbers = #tpu.dot_dimension_numbers<[1], [0], [0], [1], [0, 0, 1, 1], [], []>} : vector<32x8xf32>, vector<8x32xf32>, vector<32x32xf32> -> vector<32x32xf32>
    %156 = arith.addf %148, %155 : vector<32x32xf32>
    %157 = vector.extract_strided_slice %145 {offsets = [32, 0], sizes = [32, 32], strides = [1, 1]} : vector<128x32xf32> to vector<32x32xf32>
    %158 = vector.shape_cast %157 : vector<32x32xf32> to vector<2x16x32xf32>
    %cst_38 = arith.constant dense<0.000000e+00> : vector<2x16x8xf32>
    %159 = tpu.matmul %158, %76, %cst_38 {dimension_numbers = #tpu.dot_dimension_numbers<[2], [1], [1], [2], [0, 0, 0, 1, 1, 2], [0], [0]>} : vector<2x16x32xf32>, vector<2x32x8xf32>, vector<2x16x8xf32> -> vector<2x16x8xf32>
    %160 = vector.shape_cast %159 : vector<2x16x8xf32> to vector<32x8xf32>
    %161 = vector.extract_strided_slice %3 {offsets = [1, 0, 0], sizes = [1, 8, 32], strides = [1, 1, 1]} : vector<4x8x32xf32> to vector<1x8x32xf32>
    %162 = vector.shape_cast %161 : vector<1x8x32xf32> to vector<8x32xf32>
    %cst_39 = arith.constant dense<0.000000e+00> : vector<32x32xf32>
    %163 = tpu.matmul %160, %162, %cst_39 {dimension_numbers = #tpu.dot_dimension_numbers<[1], [0], [0], [1], [0, 0, 1, 1], [], []>} : vector<32x8xf32>, vector<8x32xf32>, vector<32x32xf32> -> vector<32x32xf32>
    %164 = arith.addf %156, %163 : vector<32x32xf32>
    %165 = vector.extract_strided_slice %145 {offsets = [64, 0], sizes = [32, 32], strides = [1, 1]} : vector<128x32xf32> to vector<32x32xf32>
    %166 = vector.shape_cast %165 : vector<32x32xf32> to vector<2x16x32xf32>
    %cst_40 = arith.constant dense<0.000000e+00> : vector<2x16x8xf32>
    %167 = tpu.matmul %166, %105, %cst_40 {dimension_numbers = #tpu.dot_dimension_numbers<[2], [1], [1], [2], [0, 0, 0, 1, 1, 2], [0], [0]>} : vector<2x16x32xf32>, vector<2x32x8xf32>, vector<2x16x8xf32> -> vector<2x16x8xf32>
    %168 = vector.shape_cast %167 : vector<2x16x8xf32> to vector<32x8xf32>
    %169 = vector.extract_strided_slice %3 {offsets = [2, 0, 0], sizes = [1, 8, 32], strides = [1, 1, 1]} : vector<4x8x32xf32> to vector<1x8x32xf32>
    %170 = vector.shape_cast %169 : vector<1x8x32xf32> to vector<8x32xf32>
    %cst_41 = arith.constant dense<0.000000e+00> : vector<32x32xf32>
    %171 = tpu.matmul %168, %170, %cst_41 {dimension_numbers = #tpu.dot_dimension_numbers<[1], [0], [0], [1], [0, 0, 1, 1], [], []>} : vector<32x8xf32>, vector<8x32xf32>, vector<32x32xf32> -> vector<32x32xf32>
    %172 = arith.addf %164, %171 : vector<32x32xf32>
    %173 = vector.extract_strided_slice %145 {offsets = [96, 0], sizes = [32, 32], strides = [1, 1]} : vector<128x32xf32> to vector<32x32xf32>
    %174 = vector.shape_cast %173 : vector<32x32xf32> to vector<2x16x32xf32>
    %cst_42 = arith.constant dense<0.000000e+00> : vector<2x16x8xf32>
    %175 = tpu.matmul %174, %134, %cst_42 {dimension_numbers = #tpu.dot_dimension_numbers<[2], [1], [1], [2], [0, 0, 0, 1, 1, 2], [0], [0]>} : vector<2x16x32xf32>, vector<2x32x8xf32>, vector<2x16x8xf32> -> vector<2x16x8xf32>
    %176 = vector.shape_cast %175 : vector<2x16x8xf32> to vector<32x8xf32>
    %177 = vector.extract_strided_slice %3 {offsets = [3, 0, 0], sizes = [1, 8, 32], strides = [1, 1, 1]} : vector<4x8x32xf32> to vector<1x8x32xf32>
    %178 = vector.shape_cast %177 : vector<1x8x32xf32> to vector<8x32xf32>
    %cst_43 = arith.constant dense<0.000000e+00> : vector<32x32xf32>
    %179 = tpu.matmul %176, %178, %cst_43 {dimension_numbers = #tpu.dot_dimension_numbers<[1], [0], [0], [1], [0, 0, 1, 1], [], []>} : vector<32x8xf32>, vector<8x32xf32>, vector<32x32xf32> -> vector<32x32xf32>
    %180 = arith.addf %172, %179 : vector<32x32xf32>
    %181 = vector.shape_cast %180 : vector<32x32xf32> to vector<2x16x32xf32>
    %c0_44 = arith.constant 0 : index
    %c0_45 = arith.constant 0 : index
    %c0_46 = arith.constant 0 : index
    %182 = vector.load %arg7[%c0_44, %c0_45, %c0_46] : memref<2x16x32xf32, #tpu.memory_space<vmem>>, vector<2x16x32xf32>
    tpu.vector_store %arg7[%c0_44, %c0_45, %c0_46], %181 {strides = array<i32>} : memref<2x16x32xf32, #tpu.memory_space<vmem>>, vector<2x16x32xf32>,
    %183 = vector.shape_cast %145 : vector<128x32xf32> to vector<4x32x32xf32>
    %cst_47 = arith.constant dense<0.000000e+00> : vector<32x32xf32>
    %184 = vector.multi_reduction <add>, %183, %cst_47 [0] : vector<4x32x32xf32> to vector<32x32xf32>
    %cst_48 = arith.constant 2.500000e-01 : f32
    %185 = vector.broadcast %cst_48 : f32 to vector<32x32xf32>
    %186 = arith.mulf %184, %185 : vector<32x32xf32>
    %187 = vector.shape_cast %186 : vector<32x32xf32> to vector<2x16x32xf32>
    %c0_49 = arith.constant 0 : index
    %c0_50 = arith.constant 0 : index
    %c0_51 = arith.constant 0 : index
    %188 = vector.load %arg8[%c0_49, %c0_50, %c0_51] : memref<2x16x32xf32, #tpu.memory_space<vmem>>, vector<2x16x32xf32>
    tpu.vector_store %arg8[%c0_49, %c0_50, %c0_51], %187 {strides = array<i32>} : memref<2x16x32xf32, #tpu.memory_space<vmem>>, vector<2x16x32xf32>,
    return
  }
  func.func @transform_0(%arg0: i32) -> (i32, i32, i32) {
    %c0_i32 = arith.constant 0 : i32
    %c0_i32_0 = arith.constant 0 : i32
    %c0_i32_1 = arith.constant 0 : i32
    return %arg0, %c0_i32, %c0_i32_0 : i32, i32, i32
  }
  func.func @transform_1(%arg0: i32) -> (i32, i32) {
    %c0_i32 = arith.constant 0 : i32
    %c0_i32_0 = arith.constant 0 : i32
    %c0_i32_1 = arith.constant 0 : i32
    return %c0_i32, %c0_i32_0 : i32, i32
  }
  func.func @transform_2(%arg0: i32) -> (i32, i32, i32, i32) {
    %c0_i32 = arith.constant 0 : i32
    %c0_i32_0 = arith.constant 0 : i32
    %c0_i32_1 = arith.constant 0 : i32
    %c0_i32_2 = arith.constant 0 : i32
    %c0_i32_3 = arith.constant 0 : i32
    return %c0_i32, %c0_i32_0, %c0_i32_1, %c0_i32_2 : i32, i32, i32, i32
  }
  func.func @transform_3(%arg0: i32) -> (i32, i32, i32) {
    %c0_i32 = arith.constant 0 : i32
    %c0_i32_0 = arith.constant 0 : i32
    %c0_i32_1 = arith.constant 0 : i32
    %c0_i32_2 = arith.constant 0 : i32
    return %c0_i32, %c0_i32_0, %c0_i32_1 : i32, i32, i32
  }
  func.func @transform_4(%arg0: i32) -> (i32, i32, i32) {
    %c0_i32 = arith.constant 0 : i32
    %c0_i32_0 = arith.constant 0 : i32
    %c0_i32_1 = arith.constant 0 : i32
    %c0_i32_2 = arith.constant 0 : i32
    return %c0_i32, %c0_i32_0, %c0_i32_1 : i32, i32, i32
  }
  func.func @transform_5(%arg0: i32) -> (i32, i32) {
    %c0_i32 = arith.constant 0 : i32
    %c0_i32_0 = arith.constant 0 : i32
    %c0_i32_1 = arith.constant 0 : i32
    return %c0_i32, %c0_i32_0 : i32, i32
  }
  func.func @transform_6(%arg0: i32) -> (i32, i32, i32) {
    %c0_i32 = arith.constant 0 : i32
    %c0_i32_0 = arith.constant 0 : i32
    %c0_i32_1 = arith.constant 0 : i32
    return %arg0, %c0_i32, %c0_i32_0 : i32, i32, i32
  }
  func.func @transform_7(%arg0: i32) -> (i32, i32, i32) {
    %c0_i32 = arith.constant 0 : i32
    %c0_i32_0 = arith.constant 0 : i32
    %c0_i32_1 = arith.constant 0 : i32
    return %arg0, %c0_i32, %c0_i32_0 : i32, i32, i32
  }
}

</mosaic_0001>

<bundles_post_ra>
// kernel: tpu_custom_call.1
= control target key start
LH: loop header
LB: loop body
LE: loop exit
PB: predicated region body
PF: predicated region fallthrough
CT: control target
= control target key end

     0   :  { %13 = vsyncpa [#allocation3], 0  ;;  %s6344_s0 = inlined_call_operand.vmem [shape: f32[4,16,32], index: 0, kind: input, shape index: {}]   ;;  %s6345_s1 = inlined_call_operand.vmem [shape: f32[64,16], index: 1, kind: input, shape index: {}]   ;;  %s6346_s2 = inlined_call_operand.vmem [shape: f32[3,4,32,8], index: 2, kind: input, shape index: {}]   ;;  %s6347_s3 = inlined_call_operand.vmem [shape: f32[4,8,32], index: 3, kind: input, shape index: {}]   ;;  %s6348_s4 = inlined_call_operand.vmem [shape: f32[3,4,8], index: 4, kind: input, shape index: {}]   ;;  %s6349_s5 = inlined_call_operand.vmem [shape: f32[1,32], index: 5, kind: input, shape index: {}]   ;;  %s6350_s6 = inlined_call_operand.hbm [shape: f32[4,16,32], index: 6, kind: output, shape index: {0}]   ;;  %s6351_s7 = inlined_call_operand.hbm [shape: f32[4,16,32], index: 7, kind: output, shape index: {1}]  }
   0x1   :  { %15 = vsyncpa [#allocation3 + $0x1], 0 }
   0x2   :  { %16 = vsyncpa [#allocation5], 0 }
   0x3   :  { %18 = vsyncpa [#allocation5 + $0x1], 0  ;;  %s5205_s24 = smov 0   ;;  %s5207_s25 = smov 0  }
   0x4   :  { %s5209_s26 = smov 0   ;;  %s5211_s27 = smov 0  }
   0x5 LB: > { %s5226_s28 = sadd.s32 4294967295, %s5159_s27   ;;  %s4038_s29 = sadd.s32 4294967294, %s5159_s27   ;;  %s5159_s27 = sphi %s5211_s27, %s6391_s27   ;;  %s5155_s26 = sphi %s5209_s26, %s6390_s26   ;;  %s5151_s25 = sphi %s5207_s25, %s6389_s25   ;;  %s5147_s24 = sphi %s5205_s24, %s6388_s24  }
   0x6   : > { %s5230_s30 = sadd.s32 1, %s5159_s27   ;;  %s162_s8 = sadd.s32 1, %s5155_s26 }
   0x7   : > { %s159_s9 = ssub.s32 %s5159_s27, %s5230_s30  ;;  %p172_p0 = scmp.ne.s32.totalorder %s5155_s26, %s5151_s25 }
   0x8   : > { %p160_p1 = scmp.eq.s32.totalorder %s159_s9, 0  ;;  %p173_p2 = scmp.eq.s32.totalorder %s5226_s28, 1 }
   0x9   : > { %p178_p3 = scmp.ne.s32.totalorder %s5151_s25, %s5147_s24  ;;  %p179_p4 = scmp.eq.s32.totalorder %s4038_s29, 1 }
   0xa   : > { %s5241_s10 = scalar_select %p160_p1, %s5155_s26, %s162_s8  }
   0xb   : > { %p5243_p5 = por %p173_p2, %p172_p0  ;;  %p5247_p6 = por %p179_p4, %p178_p3 }
   0xc   : > { %p4041_p7 = scmp.ge.s32.totalorder %s5159_s27, 1  ;;  %p248_p8 = scmp.lt.s32.totalorder %s5159_s27, 3 }
   0xe   : > { %p249_p9 = pnand %p4041_p7, %p248_p8 }
  0x10   : > { %252 = sbr.rel (%p249_p9) target bundleno = 2165 (0x875), region = 44 }
  0x15   : > { %s4044_s13 = sshll.u32 %s5226_s28, 1  ;;  %v355_v0 = vld [vmem:[%s6345_s1] sm:$0xff]  ;;  %vm363_vm0 = vcmask 130048   ;;  %v356_v5 = vld [vmem:[%s6345_s1 + $0x8] sm:$0xff]  ;;  %v357_v6 = vld [vmem:[%s6345_s1 + $0x10] sm:$0xff]  ;;  %vm602_vm1 = vcmask 261120   ;;  %v598_v40 = vlaneseq }
  0x16   : > { %p287_p10 = scmp.lt.s32.totalorder %s4044_s13, 3  ;;  %4507 = vmatprep.mubr.msk.f32.mxu0 %vm363_vm0, %v355_v0  ;;  %4523 = vmatprep.mubr.msk.f32.mxu1 %vm363_vm0, %v355_v0  ;;  %v318_v7 = vld [vmem:[%s6346_s2 + $0x98] sm:$0xff]  ;;  %v359_v9 = vld [vmem:[%s6345_s1 + $0x20] sm:$0xff]  ;;  %v317_v10 = vld [vmem:[%s6346_s2 + $0x90] sm:$0xff]  ;;  %vm966_vm2 = vcmask 64512   ;;  %s6198_s18 = sand.u32 1, %s5151_s25  }
  0x17   : > { %v358_v8 = vld [vmem:[%s6345_s1 + $0x18] sm:$0xff]  ;;  %v360_v11 = vld [vmem:[%s6345_s1 + $0x28] sm:$0xff]  ;;  %v361_v12 = vld [vmem:[%s6345_s1 + $0x30] sm:$0xff]  ;;  %v5421_v41 = vshrl.u32 %v598_v40, 7  ;;  %s6362_s29 = sshll.u32 %s5226_s28, 9  ;;  %s3913_s14 = scalar_lea.sflag [#allocation5], %s6198_s18 }
  0x18   : > { %s6393_s13 = smov (!%p287_p10, %s4044_s13), 3  ;;  %v316_v13 = vld [vmem:[%s6346_s2 + $0x88] sm:$0xff]  ;;  %v362_v14 = vld [vmem:[%s6345_s1 + $0x38] sm:$0xff]  ;;  %v315_v15 = vld [vmem:[%s6346_s2 + $0x80] sm:$0xff] }
  0x19   : > { %s4234_s16 = sshll.u32 %s6393_s13, 4  ;;  %v302_v16 = vld [vmem:[%s6346_s2 + $0x18] sm:$0xff]  ;;  %v301_v17 = vld [vmem:[%s6346_s2 + $0x10] sm:$0xff]  ;;  %v300_v18 = vld [vmem:[%s6346_s2 + $0x8] sm:$0xff]  ;;  %v5424_v42 = vsub.s32 0, %v5421_v41  ;;  %s6256_s13 = scalar_lea.hbm %s6351_s7, %s6362_s29 }
  0x1a   : > { %s291_s19 = scalar_lea.vmem %s6344_s0, %s4234_s16  ;;  %v299_v19 = vld [vmem:[%s6346_s2] sm:$0xff]  ;;  %v334_v20 = vld [vmem:[%s6346_s2 + $0x118] sm:$0xff]  ;;  %v333_v21 = vld [vmem:[%s6346_s2 + $0x110] sm:$0xff]  ;;  %s5161_s16 = smov [#allocation4]  }
  0x1b   : > { %v5262_v1 = vld [vmem:[%s291_s19 + $0x8] sm:$0xff]  ;;  %v5264_v2 = vld [vmem:[%s291_s19] sm:$0xff]  ;;  %v5266_v3 = vld [vmem:[%s291_s19 + $0x18] sm:$0xff]  ;;  %s5073_s17 = sshll.u32 %s5161_s16, 4  ;;  %s5074_s17 = int_to_ptr.vmem [resolvable:$false] %s5073_s17 }
  0x1c   : > { %4503 = vmatprep.subr.mxu0 %v5262_v1  ;;  %4519 = vmatprep.subr.mxu1 %v5266_v3  ;;  %v5270_v4 = vld [vmem:[%s291_s19 + $0x10] sm:$0xff]  ;;  %v332_v22 = vld [vmem:[%s6346_s2 + $0x108] sm:$0xff]  ;;  %v331_v23 = vld [vmem:[%s6346_s2 + $0x100] sm:$0xff]  ;;  %s4042_s19 = sshll.u32 %s6198_s18, 5 }
  0x1d   : > { %4504 = vmatpush3.msra.mxu0 %v5262_v1  ;;  %4520 = vmatpush3.msra.mxu1 %v5266_v3  ;;  %v5429_v43 = vld [vmem:[%s6348_s4] sm:$0xf]  ;;  %v5438_v53 = vld [vmem:[%s6348_s4 + $0x4] sm:$0xf]  ;;  %s6218_s20 = scalar_lea.vmem [#allocation4], %s4042_s19 }
  0x1e   : > { %4505 = vmatprep.subr.mxu0 %v5264_v2  ;;  %4521 = vmatprep.subr.mxu1 %v5270_v4  ;;  %v601_v44 = vrot.slane %v5429_v43, %v5424_v42  ;;  %v703_v56 = vrot.slane %v5438_v53, %v5424_v42  ;;  %s3944_s23 = sshll.u32 %s6218_s20, 4  ;;  %s6258_s23 = int_to_ptr.vmem [resolvable:$true] %s3944_s23 }
  0x1f   : > { %4506 = vmatpush3.msra.mxu0 %v5264_v2  ;;  %4522 = vmatpush3.msra.mxu1 %v5270_v4  ;;  %s5069_s15 = scalar_lea.vmem %s6258_s23, 512  ;;  %p5076_p0 = scmp.lt.s32.totalorder %s6258_s23, %s5074_s17 }
  0x20   : > { %4508 = vmatmul.mubr.msk.f32.vlgmr.msra.gmra.mxu0 %vm363_vm0, %v356_v5  ;;  %4524 = vmatmul.mubr.msk.f32.vlgmr.msra.gmra.mxu1 %vm363_vm0, %v356_v5  ;;  %p5070_p11 = scmp.ne.s32.totalorder %s6258_s23, %s5069_s15 }
  0x21   : > { %4510 = vmatprep.mubr.msk.f32.mxu0 %vm363_vm0, %v357_v6  ;;  %4526 = vmatprep.mubr.msk.f32.mxu1 %vm363_vm0, %v357_v6 }
  0x22   : > { %4549 = vmatprep.subr.mxu1 %v318_v7  ;;  %4535 = vmatprep.subr.mxu0 %v302_v16  ;;  %p5071_p12 = pnand %p5070_p11, %p5243_p5 }
  0x23   : > { %4550 = vmatpush3.msra.mxu1 %v318_v7  ;;  %4536 = vmatpush3.msra.mxu0 %v302_v16  ;;  %v338_v16 = vld [vmem:[%s6346_s2 + $0x138] sm:$0xff] }
  0x24   : > { %4511 = vmatmul.mubr.msk.f32.gmra.mxu0 %vm363_vm0, %v358_v8  ;;  %4527 = vmatmul.mubr.msk.f32.gmra.mxu1 %vm363_vm0, %v358_v8  ;;  %p5072_p13 = pneg %p5071_p12 }
  0x25   : > { %4513 = vmatprep.mubr.msk.f32.mxu0 %vm363_vm0, %v359_v9  ;;  %4529 = vmatprep.mubr.msk.f32.mxu1 %vm363_vm0, %v359_v9  ;;  %v306_v9 = vld [vmem:[%s6346_s2 + $0x38] sm:$0xff] }
  0x26   : > { %4551 = vmatprep.subr.mxu1 %v317_v10  ;;  %4537 = vmatprep.subr.mxu0 %v301_v17 }
  0x27   : > { %4552 = vmatpush3.msra.mxu1 %v317_v10  ;;  %4538 = vmatpush3.msra.mxu0 %v301_v17  ;;  %v321_v17 = vld [vmem:[%s6346_s2 + $0xb0] sm:$0xff] }
  0x28   : > { %4514 = vmatmul.mubr.msk.f32.gmra.mxu0 %vm363_vm0, %v360_v11  ;;  %4530 = vmatmul.mubr.msk.f32.gmra.mxu1 %vm363_vm0, %v360_v11  ;;  %v305_v11 = vld [vmem:[%s6346_s2 + $0x30] sm:$0xff] }
  0x29   : > { %4516 = vmatprep.mubr.msk.f32.mxu0 %vm363_vm0, %v361_v12  ;;  %4532 = vmatprep.mubr.msk.f32.mxu1 %vm363_vm0, %v361_v12 }
  0x2a   : > { %4553 = vmatprep.subr.mxu1 %v316_v13  ;;  %4539 = vmatprep.subr.mxu0 %v300_v18 }
  0x2b   : > { %4554 = vmatpush3.msra.mxu1 %v316_v13  ;;  %4540 = vmatpush3.msra.mxu0 %v300_v18  ;;  %v304_v13 = vld [vmem:[%s6346_s2 + $0x28] sm:$0xff]  ;;  %v337_v18 = vld [vmem:[%s6346_s2 + $0x130] sm:$0xff] }
  0x2c   : > { %4517 = vmatmul.mubr.msk.f32.gmra.mxu0 %vm363_vm0, %v362_v14  ;;  %4533 = vmatmul.mubr.msk.f32.gmra.mxu1 %vm363_vm0, %v362_v14  ;;  %v303_v14 = vld [vmem:[%s6346_s2 + $0x20] sm:$0xff] }
  0x2d   : > { %4555 = vmatprep.subr.mxu1 %v315_v15  ;;  %4543 = vmatprep.mubr.msk.f32.mxu0 %vm602_vm1, %v5264_v2 }
  0x2e   : > { %4556 = vmatpush3.msra.mxu1 %v315_v15  ;;  %4541 = vmatprep.subr.mxu0 %v299_v19  ;;  %v322_v15 = vld [vmem:[%s6346_s2 + $0xb8] sm:$0xff] }
  0x2f   : > { %4542 = vmatpush3.msra.mxu0 %v299_v19  ;;  %v320_v19 = vld [vmem:[%s6346_s2 + $0xa8] sm:$0xff] }
  0x30   : > { %4544 = vmatmul.mubr.msk.f32.vlgmr.msra.gmra.mxu0 %vm602_vm1, %v5262_v1  ;;  %4569 = vmatprep.subr.mxu0 %v334_v20 }
  0x31   : > { %4546 = vmatprep.mubr.msk.f32.mxu0 %vm602_vm1, %v5270_v4  ;;  %4570 = vmatpush3.msra.mxu0 %v334_v20  ;;  %v336_v20 = vld [vmem:[%s6346_s2 + $0x128] sm:$0xff] }
  0x32   : > { %4571 = vmatprep.subr.mxu0 %v333_v21 }
  0x33   : > { %4572 = vmatpush3.msra.mxu0 %v333_v21  ;;  %v319_v21 = vld [vmem:[%s6346_s2 + $0xa0] sm:$0xff] }
  0x34   : > { %4547 = vmatmul.mubr.msk.f32.gmra.mxu0 %vm602_vm1, %v5266_v3  ;;  %4573 = vmatprep.subr.mxu0 %v332_v22 }
  0x35   : > { %4574 = vmatpush3.msra.mxu0 %v332_v22  ;;  %v335_v22 = vld [vmem:[%s6346_s2 + $0x120] sm:$0xff] }
  0x36   : > { %4575 = vmatprep.subr.mxu0 %v331_v23 }
  0x37   : > { %4576 = vmatpush3.msra.mxu0 %v331_v23 }
  0xe0   : > { %v5357_v24 = vpop.f32.mrf.mxu0  ;;  %v5359_v25 = vpop.f32.mrf.mxu1 }
  0xe2   : > { %v5361_v26 = vpop.f32.mrf.mxu0  ;;  %v5363_v27 = vpop.f32.mrf.mxu1 }
  0xe3   : > { %4557 = vmatprep.mubr.msk.f32.mxu1 %vm602_vm1, %v5361_v26 }
  0xe4   : > { %v5367_v28 = vpop.f32.mrf.mxu0  ;;  %4558 = vmatmul.mubr.msk.f32.vlgmr.msra.gmra.mxu1 %vm602_vm1, %v5357_v24  ;;  %v5371_v29 = vpop.f32.mrf.mxu1 }
  0xe6   : > { %v5373_v30 = vpop.f32.mrf.mxu0  ;;  %v5375_v31 = vpop.f32.mrf.mxu1 }
  0xe7   : > { %4560 = vmatprep.mubr.msk.f32.mxu1 %vm602_vm1, %v5373_v30 }
  0xe8   : > { %4561 = vmatmul.mubr.msk.f32.gmra.mxu1 %vm602_vm1, %v5367_v28  ;;  %v5381_v32 = vpop.f32.mrf.mxu0  ;;  %v5383_v33 = vpop.f32.mrf.mxu1 }
  0xe9   : > { %4563 = vmatprep.mubr.msk.f32.mxu1 %vm602_vm1, %v5363_v27 }
  0xea   : > { %v5387_v34 = vpop.f32.mrf.mxu0  ;;  %v5389_v35 = vpop.f32.mrf.mxu1 }
  0xeb   : > { %4577 = vmatprep.mubr.msk.f32.mxu0 %vm602_vm1, %v5387_v34 }
  0xec   : > { %4564 = vmatmul.mubr.msk.f32.gmra.mxu1 %vm602_vm1, %v5359_v25  ;;  %v5395_v36 = vpop.f32.mrf.mxu0  ;;  %4578 = vmatmul.mubr.msk.f32.vlgmr.msra.gmra.mxu0 %vm602_vm1, %v5381_v32  ;;  %v5403_v38 = vpop.f32.mrf.mxu1 }
  0xed   : > { %4566 = vmatprep.mubr.msk.f32.mxu1 %vm602_vm1, %v5375_v31 }
  0xee   : > { %v5401_v37 = vpop.f32.mrf.mxu0  ;;  %v5413_v39 = vpop.f32.mrf.mxu1 }
  0xef   : > { %4580 = vmatprep.mubr.msk.f32.mxu0 %vm602_vm1, %v5401_v37 }
  0xf0   : > { %4567 = vmatmul.mubr.msk.f32.gmra.mxu1 %vm602_vm1, %v5371_v29  ;;  %4581 = vmatmul.mubr.msk.f32.gmra.mxu0 %vm602_vm1, %v5395_v36  ;;  %v4545_v45 = vpop.f32.mrf.mxu0 }
  0xf1   : > { %4583 = vmatprep.mubr.msk.f32.mxu0 %vm602_vm1, %v5389_v35  ;;  %v687_v46 = vadd.f32 %v4545_v45, %v601_v44 }
  0xf2   : > { %v681_v47 = vpop.f32.mrf.mxu0 }
  0xf3   : > { %v682_v48 = vadd.f32 %v681_v47, %v601_v44 }
  0xf4   : > { %4584 = vmatmul.mubr.msk.f32.gmra.mxu0 %vm602_vm1, %v5383_v33  ;;  %v4548_v49 = vpop.f32.mrf.mxu0 }
  0xf5   : > { %4586 = vmatprep.mubr.msk.f32.mxu0 %vm602_vm1, %v5413_v39  ;;  %4597 = vmatprep.mubr.msk.f32.mxu1 %vm966_vm2, %v682_v48  ;;  %v697_v50 = vadd.f32 %v4548_v49, %v601_v44 }
  0xf6   : > { %v691_v51 = vpop.f32.mrf.mxu0 }
  0xf7   : > { %v692_v52 = vadd.f32 %v691_v51, %v601_v44 }
  0xf8   : > { %4587 = vmatmul.mubr.msk.f32.gmra.mxu0 %vm602_vm1, %v5403_v38 }
  0xf9   : > { %4608 = vmatprep.mubr.msk.f32.mxu0 %vm966_vm2, %v692_v52  ;;  %v1155_v52 = vsub.s32 1, %v5421_v41 }
 0x1a4   : > { %v4559_v54 = vpop.f32.mrf.mxu1 }
 0x1a5   : > { %v800_v63 = vadd.f32 %v4559_v54, %v703_v56 }
 0x1a6   : > { %v794_v55 = vpop.f32.mrf.mxu1 }
 0x1a7   : > { %v795_v7 = vadd.f32 %v794_v55, %v703_v56 }
 0x1a8   : > { %v4562_v57 = vpop.f32.mrf.mxu1 }
 0x1a9   : > { %v810_v58 = vadd.f32 %v4562_v57, %v703_v56 }
 0x1aa   : > { %v804_v59 = vpop.f32.mrf.mxu1 }
 0x1ab   : > { %v805_v60 = vadd.f32 %v804_v59, %v703_v56  ;;  %4589 = vmatprep.subr.msk.mxu1 %vm966_vm2, %v810_v58 }
 0x1ac   : > { %v4565_v61 = vpop.f32.mrf.mxu1  ;;  %4590 = vmatpush3.xpose.msk.msra.mxu1 %vm966_vm2, %v810_v58  ;;  %v5536_v23 = vpop.f32.mrf.mxu0 }
 0x1ad   : > { %4591 = vmatprep.subr.msk.mxu1 %vm966_vm2, %v805_v60  ;;  %v820_v10 = vadd.f32 %v4565_v61, %v703_v56 }
 0x1ae   : > { %v814_v62 = vpop.f32.mrf.mxu1  ;;  %v5538_v40 = vpop.f32.mrf.mxu0 }
 0x1af   : > { %v815_v12 = vadd.f32 %v814_v62, %v703_v56 }
 0x1b0   : > { %v4568_v0 = vpop.f32.mrf.mxu1  ;;  %4592 = vmatpush3.xpose.msk.msra.mxu1 %vm966_vm2, %v805_v60  ;;  %v5540_v44 = vpop.f32.mrf.mxu0 }
 0x1b1   : > { %v830_v5 = vadd.f32 %v4568_v0, %v703_v56  ;;  %4593 = vmatprep.subr.msk.mxu1 %vm966_vm2, %v800_v63  ;;  %v5577_v0 = vld [vmem:[%s6348_s4 + $0x8] sm:$0xf] }
 0x1b2   : > { %v824_v6 = vpop.f32.mrf.mxu1  ;;  %v5542_v45 = vpop.f32.mrf.mxu0 }
 0x1b3   : > { %v825_v8 = vadd.f32 %v824_v6, %v703_v56  ;;  %4600 = vmatprep.subr.msk.mxu0 %vm966_vm2, %v830_v5  ;;  %v5562_v56 = vrot.slane %v5429_v43, %v1155_v52  ;;  %v5582_v6 = vrot.slane %v5577_v0, %v1155_v52 }
 0x1b4   : > { %4594 = vmatpush3.xpose.msk.msra.mxu1 %vm966_vm2, %v800_v63  ;;  %4601 = vmatpush3.xpose.msk.msra.mxu0 %vm966_vm2, %v830_v5 }
 0x1b5   : > { %4595 = vmatprep.subr.msk.mxu1 %vm966_vm2, %v795_v7  ;;  %4602 = vmatprep.subr.msk.mxu0 %vm966_vm2, %v825_v8  ;;  %6365 = vst [vmem:[#allocation8_spill] sm:$0xff] %v5582_v6 }
 0x1b8   : > { %4596 = vmatpush3.xpose.msk.msra.mxu1 %vm966_vm2, %v795_v7  ;;  %4603 = vmatpush3.xpose.msk.msra.mxu0 %vm966_vm2, %v825_v8 }
 0x1b9   : > { %4604 = vmatprep.subr.msk.mxu0 %vm966_vm2, %v820_v10  ;;  %4611 = vmatprep.subr.mxu1 %v306_v9 }
 0x1bb   : > { %4598 = vmatmul.mubr.msk.f32.vlgmr.msra.gmra.mxu1 %vm966_vm2, %v687_v46  ;;  %v5544_v46 = vpop.f32.mrf.mxu0 }
 0x1bc   : > { %4605 = vmatpush3.xpose.msk.msra.mxu0 %vm966_vm2, %v820_v10  ;;  %4612 = vmatpush3.msra.mxu1 %v306_v9 }
 0x1bd   : > { %4606 = vmatprep.subr.msk.mxu0 %vm966_vm2, %v815_v12  ;;  %4613 = vmatprep.subr.mxu1 %v305_v11  ;;  %v5546_v47 = vpop.f32.mrf.mxu0 }
 0x1be   : > { %4614 = vmatpush3.msra.mxu1 %v305_v11  ;;  %4619 = vmatprep.mubr.msk.f32.mxu1 %vm602_vm1, %v5264_v2 }
 0x1bf   : > { %4615 = vmatprep.subr.mxu1 %v304_v13  ;;  %v5550_v49 = vpop.f32.mrf.mxu0 }
 0x1c0   : > { %4607 = vmatpush3.xpose.msk.msra.mxu0 %vm966_vm2, %v815_v12  ;;  %4616 = vmatpush3.msra.mxu1 %v304_v13  ;;  %v1245_v13 = vrot.slane %v5438_v53, %v1155_v52 }
 0x1c1   : > { %4617 = vmatprep.subr.mxu1 %v303_v14  ;;  %4625 = vmatprep.subr.mxu0 %v322_v15  ;;  %v5557_v54 = vpop.f32.mrf.mxu0 }
 0x1c2   : > { %4618 = vmatpush3.msra.mxu1 %v303_v14 }
 0x1c3   : > { %4609 = vmatmul.mubr.msk.f32.vlgmr.msra.gmra.mxu0 %vm966_vm2, %v697_v50  ;;  %4620 = vmatmul.mubr.msk.f32.vlgmr.msra.gmra.mxu1 %vm602_vm1, %v5262_v1 }
 0x1c4   : > { %4645 = vmatprep.subr.mxu1 %v338_v16  ;;  %4626 = vmatpush3.msra.mxu0 %v322_v15 }
 0x1c5   : > { %4633 = vmatprep.mubr.msk.f32.mxu0 %vm602_vm1, %v5361_v26  ;;  %4646 = vmatpush3.msra.mxu1 %v338_v16 }
 0x1c6   : > { %4627 = vmatprep.subr.mxu0 %v321_v17  ;;  %4647 = vmatprep.subr.mxu1 %v337_v18 }
 0x1c7   : > { %4622 = vmatprep.mubr.msk.f32.mxu1 %vm602_vm1, %v5270_v4  ;;  %4628 = vmatpush3.msra.mxu0 %v321_v17 }
 0x1c8   : > { %4648 = vmatpush3.msra.mxu1 %v337_v18  ;;  %4629 = vmatprep.subr.mxu0 %v320_v19 }
 0x1c9   : > { %4623 = vmatmul.mubr.msk.f32.gmra.mxu1 %vm602_vm1, %v5266_v3  ;;  %4649 = vmatprep.subr.mxu1 %v336_v20 }
 0x1ca   : > { %4630 = vmatpush3.msra.mxu0 %v320_v19  ;;  %4650 = vmatpush3.msra.mxu1 %v336_v20 }
 0x1cb   : > { %4653 = vmatprep.mubr.msk.f32.mxu1 %vm602_vm1, %v5387_v34  ;;  %4631 = vmatprep.subr.mxu0 %v319_v21 }
 0x1cc   : > { %4651 = vmatprep.subr.mxu1 %v335_v22  ;;  %4632 = vmatpush3.msra.mxu0 %v319_v21 }
 0x1cd   : > { %4652 = vmatpush3.msra.mxu1 %v335_v22  ;;  %4634 = vmatmul.mubr.msk.f32.vlgmr.msra.gmra.mxu0 %vm602_vm1, %v5357_v24 }
 0x1ce   : > { %4654 = vmatmul.mubr.msk.f32.vlgmr.msra.gmra.mxu1 %vm602_vm1, %v5381_v32  ;;  %4636 = vmatprep.mubr.msk.f32.mxu0 %vm602_vm1, %v5373_v30 }
 0x1cf   : > { %4656 = vmatprep.mubr.msk.f32.mxu1 %vm602_vm1, %v5401_v37 }
 0x1d1   : > { %4637 = vmatmul.mubr.msk.f32.gmra.mxu0 %vm602_vm1, %v5367_v28 }
 0x1d2   : > { %4657 = vmatmul.mubr.msk.f32.gmra.mxu1 %vm602_vm1, %v5395_v36  ;;  %4639 = vmatprep.mubr.msk.f32.mxu0 %vm602_vm1, %v5363_v27 }
 0x1d3   : > { %4659 = vmatprep.mubr.msk.f32.mxu1 %vm602_vm1, %v5389_v35 }
 0x1d5   : > { %4640 = vmatmul.mubr.msk.f32.gmra.mxu0 %vm602_vm1, %v5359_v25 }
 0x1d6   : > { %4660 = vmatmul.mubr.msk.f32.gmra.mxu1 %vm602_vm1, %v5383_v33  ;;  %4642 = vmatprep.mubr.msk.f32.mxu0 %vm602_vm1, %v5375_v31 }
 0x1d7   : > { %4662 = vmatprep.mubr.msk.f32.mxu1 %vm602_vm1, %v5413_v39 }
 0x1d9   : > { %4643 = vmatmul.mubr.msk.f32.gmra.mxu0 %vm602_vm1, %v5371_v29 }
 0x1da   : > { %4663 = vmatmul.mubr.msk.f32.gmra.mxu1 %vm602_vm1, %v5403_v38 }
 0x27b   : > { %v5548_v48 = vpop.f32.mrf.mxu1 }
 0x27c   : > { %v2635_v55 = vsel %vm602_vm1, %v5548_v48, -inf }
 0x27d   : > { %v5552_v50 = vpop.f32.mrf.mxu1 }
 0x27e   : > { %v2632_v51 = vsel %vm602_vm1, %v5552_v50, -inf }
 0x27f   : > { %2633 = vmax.xlane.f32.xlu0 %v2632_v51 }
 0x283   : > { %v5564_v57 = vpop.f32.mrf.mxu0  ;;  %2636 = vmax.xlane.f32.xlu0 %v2635_v55  ;;  %v4621_v58 = vpop.f32.mrf.mxu1 }
 0x284   : > { %v2641_v5 = vsel %vm602_vm1, %v5564_v57, -inf }
 0x285   : > { %v5566_v59 = vpop.f32.mrf.mxu0  ;;  %v1223_v60 = vpop.f32.mrf.mxu1 }
 0x286   : > { %v1224_v61 = vadd.f32 %v1223_v60, %v5562_v56  ;;  %v2638_v62 = vsel %vm602_vm1, %v5566_v59, -inf }
 0x287   : > { %2639 = vmax.xlane.f32.xlu1 %v2638_v62 }
 0x288   : > { %4673 = vmatprep.mubr.msk.f32.mxu0 %vm966_vm2, %v1224_v61 }
 0x289   : > { %v5572_v63 = vpop.f32.mrf.mxu1 }
 0x28b   : > { %v1233_v7 = vpop.f32.mrf.mxu1  ;;  %2642 = vmax.xlane.f32.xlu1 %v2641_v5 }
 0x28c   : > { %v1234_v8 = vadd.f32 %v1233_v7, %v5562_v56 }
 0x28d   : > { %v4635_v9 = vpop.f32.mrf.mxu0 }
 0x28e   : > { %v4655_v10 = vpop.f32.mrf.mxu1  ;;  %4684 = vmatprep.mubr.msk.f32.mxu1 %vm966_vm2, %v1234_v8  ;;  %v1318_v62 = vadd.f32 %v4635_v9, %v1245_v13  ;;  %v310_v9 = vld [vmem:[%s6346_s2 + $0x58] sm:$0xff] }
 0x28f   : > { %v5587_v11 = vadd.f32 %v4655_v10, %v5582_v6  ;;  %v1312_v12 = vpop.f32.mrf.mxu0 }
 0x290   : > { %v1421_v14 = vpop.f32.mrf.mxu1 }
 0x291   : > { %6366 = vst [vmem:[#allocation9_spill] sm:$0xff] %v5587_v11  ;;  %v5591_v15 = vadd.f32 %v1421_v14, %v5582_v6  ;;  %v4638_v16 = vpop.f32.mrf.mxu0 }
 0x292   : > { %v1328_v17 = vadd.f32 %v4638_v16, %v1245_v13  ;;  %v4658_v18 = vpop.f32.mrf.mxu1 }
 0x293   : > { %6367 = vst [vmem:[#allocation10_spill] sm:$0xff] %v5591_v15  ;;  %v5594_v19 = vadd.f32 %v4658_v18, %v5582_v6  ;;  %v1322_v20 = vpop.f32.mrf.mxu0  ;;  %v1313_v18 = vadd.f32 %v1312_v12, %v1245_v13  ;;  %v309_v12 = vld [vmem:[%s6346_s2 + $0x50] sm:$0xff] }
 0x294   : > { %v1323_v21 = vadd.f32 %v1322_v20, %v1245_v13  ;;  %v1431_v22 = vpop.f32.mrf.mxu1  ;;  %4665 = vmatprep.subr.msk.mxu0 %vm966_vm2, %v1328_v17 }
 0x295   : > { %v5598_v51 = vadd.f32 %v1431_v22, %v5582_v6  ;;  %v4641_v55 = vpop.f32.mrf.mxu0  ;;  %4666 = vmatpush3.xpose.msk.msra.mxu0 %vm966_vm2, %v1328_v17 }
 0x296   : > { %v4661_v52 = vpop.f32.mrf.mxu1  ;;  %4667 = vmatprep.subr.msk.mxu0 %vm966_vm2, %v1323_v21  ;;  %v1338_v22 = vadd.f32 %v4641_v55, %v1245_v13  ;;  %v307_v55 = vld [vmem:[%s6346_s2 + $0x40] sm:$0xff] }
 0x297   : > { %6368 = vst [vmem:[#allocation11_spill] sm:$0xff] %v5598_v51  ;;  %v5603_v60 = vadd.f32 %v4661_v52, %v5582_v6  ;;  %v1332_v61 = vpop.f32.mrf.mxu0 }
 0x298   : > { %v1441_v5 = vpop.f32.mrf.mxu1  ;;  %v1333_v52 = vadd.f32 %v1332_v61, %v1245_v13  ;;  %v1239_v61 = vadd.f32 %v5572_v63, %v5562_v56  ;;  %v324_v63 = vld [vmem:[%s6346_s2 + $0xc8] sm:$0xff] }
 0x299   : > { %6369 = vst [vmem:[#allocation12_spill] sm:$0xff] %v5603_v60  ;;  %v5606_v7 = vadd.f32 %v1441_v5, %v5582_v6  ;;  %v4644_v8 = vpop.f32.mrf.mxu0  ;;  %4668 = vmatpush3.xpose.msk.msra.mxu0 %vm966_vm2, %v1323_v21  ;;  %v1229_v21 = vadd.f32 %v4621_v58, %v5562_v56  ;;  %v308_v58 = vld [vmem:[%s6346_s2 + $0x48] sm:$0xff]  ;;  %v325_v5 = vld [vmem:[%s6346_s2 + $0xd0] sm:$0xff] }
 0x29a   : > { %v1348_v10 = vadd.f32 %v4644_v8, %v1245_v13  ;;  %v4664_v14 = vpop.f32.mrf.mxu1  ;;  %4669 = vmatprep.subr.msk.mxu0 %vm966_vm2, %v1318_v62  ;;  %v341_v56 = vld [vmem:[%s6346_s2 + $0x150] sm:$0xff]  ;;  %v340_v8 = vld [vmem:[%s6346_s2 + $0x148] sm:$0xff] }
 0x29b   : > { %6370 = vst [vmem:[#allocation13_spill] sm:$0xff] %v5606_v7  ;;  %v5611_v16 = vadd.f32 %v4664_v14, %v5582_v6  ;;  %v1342_v17 = vpop.f32.mrf.mxu0  ;;  %v339_v14 = vld [vmem:[%s6346_s2 + $0x140] sm:$0xff] }
 0x29c   : > { %v1343_v20 = vadd.f32 %v1342_v17, %v1245_v13  ;;  %4676 = vmatprep.subr.msk.mxu1 %vm966_vm2, %v1348_v10  ;;  %v326_v13 = vld [vmem:[%s6346_s2 + $0xd8] sm:$0xff] }
 0x29d   : > { %4670 = vmatpush3.xpose.msk.msra.mxu0 %vm966_vm2, %v1318_v62  ;;  %4677 = vmatpush3.xpose.msk.msra.mxu1 %vm966_vm2, %v1348_v10  ;;  %v342_v62 = vld [vmem:[%s6346_s2 + $0x158] sm:$0xff]  ;;  %v323_v10 = vld [vmem:[%s6346_s2 + $0xc0] sm:$0xff] }
 0x29e   : > { %4671 = vmatprep.subr.msk.mxu0 %vm966_vm2, %v1313_v18  ;;  %4678 = vmatprep.subr.msk.mxu1 %vm966_vm2, %v1343_v20 }
 0x2a1   : > { %4672 = vmatpush3.xpose.msk.msra.mxu0 %vm966_vm2, %v1313_v18  ;;  %4679 = vmatpush3.xpose.msk.msra.mxu1 %vm966_vm2, %v1343_v20 }
 0x2a2   : > { %4680 = vmatprep.subr.msk.mxu1 %vm966_vm2, %v1338_v22  ;;  %4687 = vmatprep.subr.mxu0 %v310_v9 }
 0x2a4   : > { %4674 = vmatmul.mubr.msk.f32.vlgmr.msra.gmra.mxu0 %vm966_vm2, %v1229_v21 }
 0x2a5   : > { %4681 = vmatpush3.xpose.msk.msra.mxu1 %vm966_vm2, %v1338_v22  ;;  %4688 = vmatpush3.msra.mxu0 %v310_v9 }
 0x2a6   : > { %4682 = vmatprep.subr.msk.mxu1 %vm966_vm2, %v1333_v52  ;;  %4689 = vmatprep.subr.mxu0 %v309_v12 }
 0x2a7   : > { %4690 = vmatpush3.msra.mxu0 %v309_v12  ;;  %4695 = vmatprep.mubr.msk.f32.mxu0 %vm602_vm1, %v5264_v2 }
 0x2a8   : > { %4691 = vmatprep.subr.mxu0 %v308_v58 }
 0x2a9   : > { %4683 = vmatpush3.xpose.msk.msra.mxu1 %vm966_vm2, %v1333_v52  ;;  %4692 = vmatpush3.msra.mxu0 %v308_v58 }
 0x2aa   : > { %4693 = vmatprep.subr.mxu0 %v307_v55  ;;  %4701 = vmatprep.subr.mxu1 %v326_v13 }
 0x2ab   : > { %4694 = vmatpush3.msra.mxu0 %v307_v55 }
 0x2ac   : > { %4685 = vmatmul.mubr.msk.f32.vlgmr.msra.gmra.mxu1 %vm966_vm2, %v1239_v61  ;;  %4696 = vmatmul.mubr.msk.f32.vlgmr.msra.gmra.mxu0 %vm602_vm1, %v5262_v1 }
 0x2ad   : > { %4721 = vmatprep.subr.mxu0 %v342_v62  ;;  %4702 = vmatpush3.msra.mxu1 %v326_v13 }
 0x2ae   : > { %4709 = vmatprep.mubr.msk.f32.mxu1 %vm602_vm1, %v5361_v26  ;;  %4722 = vmatpush3.msra.mxu0 %v342_v62 }
 0x2af   : > { %4703 = vmatprep.subr.mxu1 %v325_v5  ;;  %4723 = vmatprep.subr.mxu0 %v341_v56 }
 0x2b0   : > { %4698 = vmatprep.mubr.msk.f32.mxu0 %vm602_vm1, %v5270_v4  ;;  %4704 = vmatpush3.msra.mxu1 %v325_v5 }
 0x2b1   : > { %4724 = vmatpush3.msra.mxu0 %v341_v56  ;;  %4705 = vmatprep.subr.mxu1 %v324_v63 }
 0x2b2   : > { %4699 = vmatmul.mubr.msk.f32.gmra.mxu0 %vm602_vm1, %v5266_v3  ;;  %4725 = vmatprep.subr.mxu0 %v340_v8 }
 0x2b3   : > { %4706 = vmatpush3.msra.mxu1 %v324_v63  ;;  %4726 = vmatpush3.msra.mxu0 %v340_v8 }
 0x2b4   : > { %4729 = vmatprep.mubr.msk.f32.mxu0 %vm602_vm1, %v5387_v34  ;;  %4707 = vmatprep.subr.mxu1 %v323_v10 }
 0x2b5   : > { %4727 = vmatprep.subr.mxu0 %v339_v14  ;;  %4708 = vmatpush3.msra.mxu1 %v323_v10 }
 0x2b6   : > { %4728 = vmatpush3.msra.mxu0 %v339_v14  ;;  %4710 = vmatmul.mubr.msk.f32.vlgmr.msra.gmra.mxu1 %vm602_vm1, %v5357_v24 }
 0x2b7   : > { %4730 = vmatmul.mubr.msk.f32.vlgmr.msra.gmra.mxu0 %vm602_vm1, %v5381_v32  ;;  %4712 = vmatprep.mubr.msk.f32.mxu1 %vm602_vm1, %v5373_v30 }
 0x2b8   : > { %4732 = vmatprep.mubr.msk.f32.mxu0 %vm602_vm1, %v5401_v37 }
 0x2ba   : > { %4713 = vmatmul.mubr.msk.f32.gmra.mxu1 %vm602_vm1, %v5367_v28 }
 0x2bb   : > { %4733 = vmatmul.mubr.msk.f32.gmra.mxu0 %vm602_vm1, %v5395_v36  ;;  %4715 = vmatprep.mubr.msk.f32.mxu1 %vm602_vm1, %v5363_v27 }
 0x2bc   : > { %4735 = vmatprep.mubr.msk.f32.mxu0 %vm602_vm1, %v5389_v35 }
 0x2be   : > { %4716 = vmatmul.mubr.msk.f32.gmra.mxu1 %vm602_vm1, %v5359_v25 }
 0x2bf   : > { %4736 = vmatmul.mubr.msk.f32.gmra.mxu0 %vm602_vm1, %v5383_v33  ;;  %4718 = vmatprep.mubr.msk.f32.mxu1 %vm602_vm1, %v5375_v31 }
 0x2c0   : > { %4738 = vmatprep.mubr.msk.f32.mxu0 %vm602_vm1, %v5413_v39 }
 0x2c2   : > { %4719 = vmatmul.mubr.msk.f32.gmra.mxu1 %vm602_vm1, %v5371_v29 }
 0x2c3   : > { %4739 = vmatmul.mubr.msk.f32.gmra.mxu0 %vm602_vm1, %v5403_v38 }
 0x308   : > { %v2634_v17 = vpop.xlane.xlu0 %2633 }
 0x309   : > { %v2680_v18 = vsub.f32 %v5552_v50, %v2634_v17 }
 0x30b   : > { %v2696_v20 = vmul.f32 1.442695, %v2680_v18  ;;  %v1648_v18 = vsub.s32 2, %v5421_v41 }
 0x30c   : > { %v2637_v9 = vpop.xlane.xlu0 %2636 }
 0x30d   : > { %5005 = vpow2.f32 %v2696_v20  ;;  %v2681_v21 = vsub.f32 %v5548_v48, %v2637_v9  ;;  %v5734_v20 = vpop.f32.mrf.mxu1  ;;  %v5737_v9 = vrot.slane %v5429_v43, %v1648_v18 }
 0x30e   : > { %6371 = vst [vmem:[#allocation14_spill] sm:$0xff] %v5734_v20 }
 0x30f   : > { %v2698_v22 = vmul.f32 1.442695, %v2681_v21 }
 0x310   : > { %v2640_v12 = vpop.xlane.xlu1 %2639 }
 0x311   : > { %5007 = vpow2.f32 %v2698_v22  ;;  %v2682_v52 = vsub.f32 %v5566_v59, %v2640_v12 }
 0x313   : > { %v2700_v58 = vmul.f32 1.442695, %v2682_v52 }
 0x314   : > { %v2643_v55 = vpop.xlane.xlu1 %2642 }
 0x315   : > { %5009 = vpow2.f32 %v2700_v58  ;;  %v2683_v13 = vsub.f32 %v5564_v57, %v2643_v55 }
 0x317   : > { %v2702_v61 = vmul.f32 1.442695, %v2683_v13 }
 0x319   : > { %5011 = vpow2.f32 %v2702_v61 }
 0x31a   : > { %v5709_v62 = vpop.eup %5005 }
 0x31b   : > { %v2728_v50 = vsel %vm602_vm1, %v5709_v62, 0.0 }
 0x31c   : > { %2729 = vadd.xlane.f32.xlu0 %v2728_v50  ;;  %v5752_v50 = vrot.slane %v5577_v0, %v1648_v18 }
 0x31e   : > { %v5713_v5 = vpop.eup %5007 }
 0x31f   : > { %v2731_v48 = vsel %vm602_vm1, %v5713_v5, 0.0 }
 0x320   : > { %2732 = vadd.xlane.f32.xlu1 %v2731_v48 }
 0x322   : > { %v5717_v59 = vpop.eup %5009 }
 0x323   : > { %v2734_v56 = vsel %vm602_vm1, %v5717_v59, 0.0 }
 0x324   : > { %2735 = vadd.xlane.f32.xlu0 %v2734_v56 }
 0x326   : > { %v5721_v57 = vpop.eup %5011 }
 0x327   : > { %v2737_v63 = vsel %vm602_vm1, %v5721_v57, 0.0 }
 0x328   : > { %2738 = vadd.xlane.f32.xlu1 %v2737_v63 }
 0x364   : > { %v5725_v8 = vpop.f32.mrf.mxu0 }
 0x365   : > { %v2647_v10 = vsel %vm602_vm1, %v5725_v8, -inf }
 0x366   : > { %2648 = vmax.xlane.f32.xlu1 %v2647_v10  ;;  %v5729_v14 = vpop.f32.mrf.mxu0 }
 0x367   : > { %v2644_v17 = vsel %vm602_vm1, %v5729_v14, -inf }
 0x368   : > { %2645 = vmax.xlane.f32.xlu0 %v2644_v17 }
 0x36c   : > { %v5739_v21 = vpop.f32.mrf.mxu1  ;;  %v4697_v22 = vpop.f32.mrf.mxu0 }
 0x36d   : > { %v2653_v12 = vsel %vm602_vm1, %v5739_v21, -inf }
 0x36e   : > { %v5743_v52 = vpop.f32.mrf.mxu1  ;;  %2654 = vmax.xlane.f32.xlu1 %v2653_v12  ;;  %v1716_v58 = vpop.f32.mrf.mxu0 }
 0x36f   : > { %v1717_v55 = vadd.f32 %v1716_v58, %v5737_v9  ;;  %v2650_v13 = vsel %vm602_vm1, %v5743_v52, -inf  ;;  %v1738_v58 = vrot.slane %v5438_v53, %v1648_v18 }
 0x370   : > { %2651 = vmax.xlane.f32.xlu0 %v2650_v13 }
 0x371   : > { %4749 = vmatprep.mubr.msk.f32.mxu1 %vm966_vm2, %v1717_v55 }
 0x372   : > { %v5749_v61 = vpop.f32.mrf.mxu0 }
 0x374   : > { %v1726_v48 = vpop.f32.mrf.mxu0 }
 0x375   : > { %v1727_v56 = vadd.f32 %v1726_v48, %v5737_v9 }
 0x376   : > { %v4711_v63 = vpop.f32.mrf.mxu1 }
 0x377   : > { %v4731_v10 = vpop.f32.mrf.mxu0  ;;  %4760 = vmatprep.mubr.msk.f32.mxu0 %vm966_vm2, %v1727_v56 }
 0x378   : > { %v5757_v17 = vadd.f32 %v4731_v10, %v5752_v50  ;;  %v1805_v12 = vpop.f32.mrf.mxu1 }
 0x379   : > { %v1914_v13 = vpop.f32.mrf.mxu0  ;;  %v1806_v51 = vadd.f32 %v1805_v12, %v1738_v58 }
 0x37a   : > { %6372 = vst [vmem:[#allocation15_spill] sm:$0xff] %v5757_v17  ;;  %v5761_v55 = vadd.f32 %v1914_v13, %v5752_v50  ;;  %v4714_v7 = vpop.f32.mrf.mxu1 }
 0x37b   : > { %v1821_v60 = vadd.f32 %v4714_v7, %v1738_v58  ;;  %v4734_v20 = vpop.f32.mrf.mxu0 }
 0x37c   : > { %6373 = vst [vmem:[#allocation16_spill] sm:$0xff] %v5761_v55  ;;  %v5764_v6 = vadd.f32 %v4734_v20, %v5752_v50  ;;  %v1815_v48 = vpop.f32.mrf.mxu1  ;;  %v1811_v20 = vadd.f32 %v4711_v63, %v1738_v58  ;;  %v1722_v63 = vadd.f32 %v4697_v22, %v5737_v9  ;;  %v312_v22 = vld [vmem:[%s6346_s2 + $0x68] sm:$0xff] }
 0x37d   : > { %v1816_v15 = vadd.f32 %v1815_v48, %v1738_v58  ;;  %v1924_v11 = vpop.f32.mrf.mxu0  ;;  %4741 = vmatprep.subr.msk.mxu1 %vm966_vm2, %v1821_v60 }
 0x37e   : > { %6374 = vst [vmem:[#allocation17_spill] sm:$0xff] %v5764_v6  ;;  %v5768_v56 = vadd.f32 %v1924_v11, %v5752_v50  ;;  %v4717_v10 = vpop.f32.mrf.mxu1  ;;  %4742 = vmatpush3.xpose.msk.msra.mxu1 %vm966_vm2, %v1821_v60 }
 0x37f   : > { %v4737_v18 = vpop.f32.mrf.mxu0  ;;  %4743 = vmatprep.subr.msk.mxu1 %vm966_vm2, %v1816_v15 }
 0x380   : > { %6375 = vst [vmem:[#allocation18_spill] sm:$0xff] %v5768_v56  ;;  %v5773_v7 = vadd.f32 %v4737_v18, %v5752_v50  ;;  %v1825_v13 = vpop.f32.mrf.mxu1 }
 0x381   : > { %v1934_v55 = vpop.f32.mrf.mxu0  ;;  %v1826_v12 = vadd.f32 %v1825_v13, %v1738_v58 }
 0x382   : > { %v5776_v48 = vadd.f32 %v1934_v55, %v5752_v50  ;;  %v4720_v17 = vpop.f32.mrf.mxu1  ;;  %4744 = vmatpush3.xpose.msk.msra.mxu1 %vm966_vm2, %v1816_v15  ;;  %v314_v15 = vld [vmem:[%s6346_s2 + $0x78] sm:$0xff]  ;;  %v1732_v55 = vadd.f32 %v5749_v61, %v5737_v9  ;;  %v345_v9 = vld [vmem:[%s6346_s2 + $0x170] sm:$0xff]  ;;  %v328_v61 = vld [vmem:[%s6346_s2 + $0xe8] sm:$0xff] }
 0x383   : > { %v1841_v11 = vadd.f32 %v4720_v17, %v1738_v58  ;;  %v4740_v56 = vpop.f32.mrf.mxu0  ;;  %4745 = vmatprep.subr.msk.mxu1 %vm966_vm2, %v1811_v20  ;;  %v1831_v17 = vadd.f32 %v4717_v10, %v1738_v58  ;;  %v343_v10 = vld [vmem:[%s6346_s2 + $0x160] sm:$0xff] }
 0x384   : > { %v5781_v60 = vadd.f32 %v4740_v56, %v5752_v50  ;;  %v1835_v6 = vpop.f32.mrf.mxu1  ;;  %v346_v56 = vld [vmem:[%s6346_s2 + $0x178] sm:$0xff] }
 0x385   : > { %v1836_v18 = vadd.f32 %v1835_v6, %v1738_v58  ;;  %4752 = vmatprep.subr.msk.mxu0 %vm966_vm2, %v1841_v11  ;;  %v313_v6 = vld [vmem:[%s6346_s2 + $0x70] sm:$0xff]  ;;  %v330_v58 = vld [vmem:[%s6346_s2 + $0xf8] sm:$0xff] }
 0x386   : > { %4746 = vmatpush3.xpose.msk.msra.mxu1 %vm966_vm2, %v1811_v20  ;;  %4753 = vmatpush3.xpose.msk.msra.mxu0 %vm966_vm2, %v1841_v11 }
 0x387   : > { %4747 = vmatprep.subr.msk.mxu1 %vm966_vm2, %v1806_v51  ;;  %4754 = vmatprep.subr.msk.mxu0 %vm966_vm2, %v1836_v18 }
 0x38a   : > { %4748 = vmatpush3.xpose.msk.msra.mxu1 %vm966_vm2, %v1806_v51  ;;  %4755 = vmatpush3.xpose.msk.msra.mxu0 %vm966_vm2, %v1836_v18  ;;  %v311_v51 = vld [vmem:[%s6346_s2 + $0x60] sm:$0xff] }
 0x38b   : > { %4756 = vmatprep.subr.msk.mxu0 %vm966_vm2, %v1831_v17  ;;  %4763 = vmatprep.subr.mxu1 %v314_v15 }
 0x38d   : > { %4750 = vmatmul.mubr.msk.f32.vlgmr.msra.gmra.mxu1 %vm966_vm2, %v1722_v63 }
 0x38e   : > { %4757 = vmatpush3.xpose.msk.msra.mxu0 %vm966_vm2, %v1831_v17  ;;  %4764 = vmatpush3.msra.mxu1 %v314_v15 }
 0x38f   : > { %4758 = vmatprep.subr.msk.mxu0 %vm966_vm2, %v1826_v12  ;;  %4765 = vmatprep.subr.mxu1 %v313_v6 }
 0x390   : > { %4766 = vmatpush3.msra.mxu1 %v313_v6  ;;  %4771 = vmatprep.mubr.msk.f32.mxu1 %vm602_vm1, %v5264_v2  ;;  %v329_v2 = vld [vmem:[%s6346_s2 + $0xf0] sm:$0xff]  ;;  %v2141_v6 = vsub.s32 3, %v5421_v41 }
 0x391   : > { %4767 = vmatprep.subr.mxu1 %v312_v22 }
 0x392   : > { %4759 = vmatpush3.xpose.msk.msra.mxu0 %vm966_vm2, %v1826_v12  ;;  %4768 = vmatpush3.msra.mxu1 %v312_v22  ;;  %v5912_v12 = vpop.f32.mrf.mxu0  ;;  %v5915_v22 = vrot.slane %v5429_v43, %v2141_v6 }
 0x393   : > { %4769 = vmatprep.subr.mxu1 %v311_v51  ;;  %4777 = vmatprep.subr.mxu0 %v330_v58 }
 0x394   : > { %4770 = vmatpush3.msra.mxu1 %v311_v51 }
 0x395   : > { %4761 = vmatmul.mubr.msk.f32.vlgmr.msra.gmra.mxu0 %vm966_vm2, %v1732_v55  ;;  %4772 = vmatmul.mubr.msk.f32.vlgmr.msra.gmra.mxu1 %vm602_vm1, %v5262_v1  ;;  %v344_v1 = vld [vmem:[%s6346_s2 + $0x168] sm:$0xff] }
 0x396   : > { %4797 = vmatprep.subr.mxu1 %v346_v56  ;;  %4778 = vmatpush3.msra.mxu0 %v330_v58 }
 0x397   : > { %4785 = vmatprep.mubr.msk.f32.mxu0 %vm602_vm1, %v5361_v26  ;;  %4798 = vmatpush3.msra.mxu1 %v346_v56  ;;  %v327_v26 = vld [vmem:[%s6346_s2 + $0xe0] sm:$0xff] }
 0x398   : > { %4779 = vmatprep.subr.mxu0 %v329_v2  ;;  %4799 = vmatprep.subr.mxu1 %v345_v9 }
 0x399   : > { %4774 = vmatprep.mubr.msk.f32.mxu1 %vm602_vm1, %v5270_v4  ;;  %4780 = vmatpush3.msra.mxu0 %v329_v2 }
 0x39a   : > { %4800 = vmatpush3.msra.mxu1 %v345_v9  ;;  %4781 = vmatprep.subr.mxu0 %v328_v61 }
 0x39b   : > { %4775 = vmatmul.mubr.msk.f32.gmra.mxu1 %vm602_vm1, %v5266_v3  ;;  %4801 = vmatprep.subr.mxu1 %v344_v1 }
 0x39c   : > { %4782 = vmatpush3.msra.mxu0 %v328_v61  ;;  %4802 = vmatpush3.msra.mxu1 %v344_v1  ;;  %v5930_v61 = vrot.slane %v5577_v0, %v2141_v6 }
 0x39d   : > { %4805 = vmatprep.mubr.msk.f32.mxu1 %vm602_vm1, %v5387_v34  ;;  %4783 = vmatprep.subr.mxu0 %v327_v26 }
 0x39e   : > { %4803 = vmatprep.subr.mxu1 %v343_v10  ;;  %4784 = vmatpush3.msra.mxu0 %v327_v26 }
 0x39f   : > { %4804 = vmatpush3.msra.mxu1 %v343_v10  ;;  %4786 = vmatmul.mubr.msk.f32.vlgmr.msra.gmra.mxu0 %vm602_vm1, %v5357_v24 }
 0x3a0   : > { %4806 = vmatmul.mubr.msk.f32.vlgmr.msra.gmra.mxu1 %vm602_vm1, %v5381_v32  ;;  %4788 = vmatprep.mubr.msk.f32.mxu0 %vm602_vm1, %v5373_v30 }
 0x3a1   : > { %4808 = vmatprep.mubr.msk.f32.mxu1 %vm602_vm1, %v5401_v37 }
 0x3a3   : > { %4789 = vmatmul.mubr.msk.f32.gmra.mxu0 %vm602_vm1, %v5367_v28 }
 0x3a4   : > { %4809 = vmatmul.mubr.msk.f32.gmra.mxu1 %vm602_vm1, %v5395_v36  ;;  %4791 = vmatprep.mubr.msk.f32.mxu0 %vm602_vm1, %v5363_v27 }
 0x3a5   : > { %4811 = vmatprep.mubr.msk.f32.mxu1 %vm602_vm1, %v5389_v35  ;;  %v5877_v4 = vpop.xlane.xlu0 %2729 }
 0x3a7   : > { %4792 = vmatmul.mubr.msk.f32.gmra.mxu0 %vm602_vm1, %v5359_v25 }
 0x3a8   : > { %4812 = vmatmul.mubr.msk.f32.gmra.mxu1 %vm602_vm1, %v5383_v33  ;;  %4794 = vmatprep.mubr.msk.f32.mxu0 %vm602_vm1, %v5375_v31 }
 0x3a9   : > { %4814 = vmatprep.mubr.msk.f32.mxu1 %vm602_vm1, %v5413_v39  ;;  %v5875_v3 = vpop.xlane.xlu1 %2732 }
 0x3ab   : > { %4795 = vmatmul.mubr.msk.f32.gmra.mxu0 %vm602_vm1, %v5371_v29 }
 0x3ac   : > { %4815 = vmatmul.mubr.msk.f32.gmra.mxu1 %vm602_vm1, %v5403_v38 }
 0x3ad   : > { %v5881_v25 = vpop.xlane.xlu0 %2735 }
 0x3b1   : > { %v5879_v24 = vpop.xlane.xlu1 %2738 }
 0x3ef   : > { %v2649_v27 = vpop.xlane.xlu1 %2648 }
 0x3f0   : > { %v2685_v28 = vsub.f32 %v5725_v8, %v2649_v27 }
 0x3f1   : > { %v2646_v30 = vpop.xlane.xlu0 %2645 }
 0x3f2   : > { %v2706_v31 = vmul.f32 1.442695, %v2685_v28  ;;  %v2684_v32 = vsub.f32 %v5729_v14, %v2646_v30 }
 0x3f4   : > { %5013 = vpow2.f32 %v2706_v31  ;;  %v2704_v29 = vmul.f32 1.442695, %v2684_v32  ;;  %v2231_v31 = vrot.slane %v5438_v53, %v2141_v6 }
 0x3f6   : > { %5015 = vpow2.f32 %v2704_v29 }
 0x3f7   : > { %v2655_v33 = vpop.xlane.xlu1 %2654 }
 0x3f8   : > { %v2687_v34 = vsub.f32 %v5739_v21, %v2655_v33 }
 0x3f9   : > { %v2652_v35 = vpop.xlane.xlu0 %2651 }
 0x3fa   : > { %v2710_v36 = vmul.f32 1.442695, %v2687_v34  ;;  %v2686_v37 = vsub.f32 %v5743_v52, %v2652_v35 }
 0x3fc   : > { %5017 = vpow2.f32 %v2710_v36  ;;  %v2708_v38 = vmul.f32 1.442695, %v2686_v37 }
 0x3fe   : > { %5019 = vpow2.f32 %v2708_v38 }
 0x3ff   : > { %5021 = vrcp.f32 %v5877_v4 }
 0x400   : > { %5023 = vrcp.f32 %v5875_v3 }
 0x401   : > { %v5887_v39 = vpop.eup %5013  ;;  %5025 = vrcp.f32 %v5881_v25 }
 0x402   : > { %v2743_v8 = vsel %vm602_vm1, %v5887_v39, 0.0  ;;  %5027 = vrcp.f32 %v5879_v24 }
 0x403   : > { %v5891_v13 = vpop.eup %5015  ;;  %2744 = vadd.xlane.f32.xlu1 %v2743_v8 }
 0x404   : > { %v2740_v14 = vsel %vm602_vm1, %v5891_v13, 0.0 }
 0x405   : > { %2741 = vadd.xlane.f32.xlu0 %v2740_v14 }
 0x409   : > { %v5895_v21 = vpop.eup %5017 }
 0x40a   : > { %v2749_v52 = vsel %vm602_vm1, %v5895_v21, 0.0 }
 0x40b   : > { %v5899_v20 = vpop.eup %5019  ;;  %2750 = vadd.xlane.f32.xlu1 %v2749_v52 }
 0x40c   : > { %v2746_v11 = vsel %vm602_vm1, %v5899_v20, 0.0 }
 0x40d   : > { %2747 = vadd.xlane.f32.xlu0 %v2746_v11 }
 0x44d   : > { %v5903_v18 = vpop.f32.mrf.mxu1 }
 0x44e   : > { %v2659_v15 = vsel %vm602_vm1, %v5903_v18, -inf }
 0x44f   : > { %2660 = vmax.xlane.f32.xlu1 %v2659_v15  ;;  %v5907_v63 = vpop.f32.mrf.mxu1 }
 0x450   : > { %v2656_v17 = vsel %vm602_vm1, %v5907_v63, -inf }
 0x451   : > { %2657 = vmax.xlane.f32.xlu0 %v2656_v17 }
 0x455   : > { %v5917_v51 = vpop.f32.mrf.mxu0  ;;  %v4773_v58 = vpop.f32.mrf.mxu1 }
 0x456   : > { %v2665_v55 = vsel %vm602_vm1, %v5917_v51, -inf }
 0x457   : > { %v5921_v56 = vpop.f32.mrf.mxu0  ;;  %2666 = vmax.xlane.f32.xlu1 %v2665_v55  ;;  %v2209_v2 = vpop.f32.mrf.mxu1 }
 0x458   : > { %v2210_v9 = vadd.f32 %v2209_v2, %v5915_v22  ;;  %v2662_v41 = vsel %vm602_vm1, %v5921_v56, -inf }
 0x459   : > { %2663 = vmax.xlane.f32.xlu0 %v2662_v41 }
 0x45a   : > { %4825 = vmatprep.mubr.msk.f32.mxu0 %vm966_vm2, %v2210_v9 }
 0x45b   : > { %v5927_v43 = vpop.f32.mrf.mxu1 }
 0x45d   : > { %v2219_v1 = vpop.f32.mrf.mxu1 }
 0x45e   : > { %v2220_v26 = vadd.f32 %v2219_v1, %v5915_v22 }
 0x45f   : > { %v4787_v10 = vpop.f32.mrf.mxu0 }
 0x460   : > { %v4807_v27 = vpop.f32.mrf.mxu1  ;;  %4836 = vmatprep.mubr.msk.f32.mxu1 %vm966_vm2, %v2220_v26  ;;  %v2304_v15 = vadd.f32 %v4787_v10, %v2231_v31  ;;  %v836_v10 = vrot.slane %v5577_v0, %v5424_v42 }
 0x461   : > { %v5935_v28 = vadd.f32 %v4807_v27, %v5930_v61  ;;  %v2298_v30 = vpop.f32.mrf.mxu0  ;;  %v2215_v27 = vadd.f32 %v4773_v58, %v5915_v22 }
 0x462   : > { %v2407_v32 = vpop.f32.mrf.mxu1  ;;  %v2299_v1 = vadd.f32 %v2298_v30, %v2231_v31  ;;  %v943_v3 = vadd.f32 %v5540_v44, %v836_v10  ;;  %v5022_v30 = vpop.eup %5021  ;;  %v938_v44 = vadd.f32 %v5542_v45, %v836_v10  ;;  %v933_v58 = vadd.f32 %v5536_v23, %v836_v10  ;;  %v347_v23 = vld [vmem:[%s6347_s3] sm:$0xff] }
 0x463   : > { %v5939_v29 = vadd.f32 %v2407_v32, %v5930_v61  ;;  %v4790_v33 = vpop.f32.mrf.mxu0  ;;  %v5978_v0 = vmul.f32 %v5022_v30, %v5709_v62  ;;  %v5024_v24 = vpop.eup %5023  ;;  %v928_v62 = vadd.f32 %v5538_v40, %v836_v10  ;;  %v2225_v45 = vadd.f32 %v5927_v43, %v5915_v22  ;;  %v6377_v43 = vld [vmem:[#allocation9_spill] sm:$0xff] }
 0x464   : > { %v2314_v34 = vadd.f32 %v4790_v33, %v2231_v31  ;;  %v5941_v35 = vpop.f32.mrf.mxu1  ;;  %v5026_v32 = vpop.eup %5025  ;;  %v5995_v33 = vmul.f32 %v5024_v24, %v5713_v5  ;;  %v953_v22 = vadd.f32 %v5544_v46, %v836_v10  ;;  %v6376_v46 = vld [vmem:[#allocation11_spill] sm:$0xff] }
 0x465   : > { %v2308_v36 = vpop.f32.mrf.mxu0  ;;  %v5999_v40 = vmul.f32 %v5026_v32, %v5717_v59  ;;  %v5028_v5 = vpop.eup %5027  ;;  %v948_v59 = vadd.f32 %v5546_v47, %v836_v10 }
 0x466   : > { %v2309_v37 = vadd.f32 %v2308_v36, %v2231_v31  ;;  %v2417_v38 = vpop.f32.mrf.mxu1  ;;  %4817 = vmatprep.subr.msk.mxu0 %vm966_vm2, %v2314_v34 }
 0x467   : > { %v5946_v8 = vadd.f32 %v2417_v38, %v5930_v61  ;;  %v4793_v14 = vpop.f32.mrf.mxu0  ;;  %4818 = vmatpush3.xpose.msk.msra.mxu0 %vm966_vm2, %v2314_v34  ;;  %v6378_v34 = vld [vmem:[#allocation10_spill] sm:$0xff] }
 0x468   : > { %v4813_v53 = vpop.f32.mrf.mxu1  ;;  %4819 = vmatprep.subr.msk.mxu0 %vm966_vm2, %v2309_v37  ;;  %v2324_v25 = vadd.f32 %v4793_v14, %v2231_v31 }
 0x469   : > { %v5951_v52 = vadd.f32 %v4813_v53, %v5930_v61  ;;  %v2318_v11 = vpop.f32.mrf.mxu0 }
 0x46a   : > { %v2427_v17 = vpop.f32.mrf.mxu1  ;;  %v2319_v42 = vadd.f32 %v2318_v11, %v2231_v31 }
 0x46b   : > { %v5954_v4 = vadd.f32 %v2427_v17, %v5930_v61  ;;  %v4796_v6 = vpop.f32.mrf.mxu0  ;;  %4820 = vmatpush3.xpose.msk.msra.mxu0 %vm966_vm2, %v2309_v37 }
 0x46c   : > { %v2334_v55 = vadd.f32 %v4796_v6, %v2231_v31  ;;  %v4816_v2 = vpop.f32.mrf.mxu1  ;;  %4821 = vmatprep.subr.msk.mxu0 %vm966_vm2, %v2304_v15 }
 0x46d   : > { %v5960_v9 = vadd.f32 %v4816_v2, %v5930_v61  ;;  %v2328_v41 = vpop.f32.mrf.mxu0 }
 0x46e   : > { %v2329_v26 = vadd.f32 %v2328_v41, %v2231_v31  ;;  %4828 = vmatprep.subr.msk.mxu1 %vm966_vm2, %v2334_v55  ;;  %v963_v31 = vadd.f32 %v5550_v49, %v836_v10  ;;  %v958_v49 = vadd.f32 %v5557_v54, %v836_v10  ;;  %v6010_v54 = vmul.f32 %v5028_v5, %v5721_v57  ;;  %v348_v57 = vld [vmem:[%s6347_s3 + $0x8] sm:$0xff]  ;;  %v6064_v32 = vpop.f32.mrf.mxu1 }
 0x46f   : > { %4822 = vmatpush3.xpose.msk.msra.mxu0 %vm966_vm2, %v2304_v15  ;;  %4829 = vmatpush3.xpose.msk.msra.mxu1 %vm966_vm2, %v2334_v55 }
 0x470   : > { %4823 = vmatprep.subr.msk.mxu0 %vm966_vm2, %v2299_v1  ;;  %4830 = vmatprep.subr.msk.mxu1 %vm966_vm2, %v2329_v26 }
 0x473   : > { %4824 = vmatpush3.xpose.msk.msra.mxu0 %vm966_vm2, %v2299_v1  ;;  %4831 = vmatpush3.xpose.msk.msra.mxu1 %vm966_vm2, %v2329_v26 }
 0x474   : > { %4832 = vmatprep.subr.msk.mxu1 %vm966_vm2, %v2324_v25  ;;  %4839 = vmatprep.subr.mxu0 %v943_v3 }
 0x476   : > { %4826 = vmatmul.mubr.msk.f32.vlgmr.msra.gmra.mxu0 %vm966_vm2, %v2215_v27 }
 0x477   : > { %4833 = vmatpush3.xpose.msk.msra.mxu1 %vm966_vm2, %v2324_v25  ;;  %4840 = vmatpush3.msra.mxu0 %v943_v3 }
 0x478   : > { %4847 = vmatprep.mubr.msk.f32.mxu0 %vm602_vm1, %v5978_v0  ;;  %4834 = vmatprep.subr.msk.mxu1 %vm966_vm2, %v2319_v42 }
 0x479   : > { %4841 = vmatprep.subr.mxu0 %v938_v44 }
 0x47a   : > { %4842 = vmatpush3.msra.mxu0 %v938_v44 }
 0x47b   : > { %4843 = vmatprep.subr.mxu0 %v933_v58  ;;  %4835 = vmatpush3.xpose.msk.msra.mxu1 %vm966_vm2, %v2319_v42 }
 0x47c   : > { %4844 = vmatpush3.msra.mxu0 %v933_v58  ;;  %4850 = vmatprep.subr.mxu1 %v963_v31 }
 0x47d   : > { %4845 = vmatprep.subr.mxu0 %v928_v62 }
 0x47e   : > { %4846 = vmatpush3.msra.mxu0 %v928_v62  ;;  %4837 = vmatmul.mubr.msk.f32.vlgmr.msra.gmra.mxu1 %vm966_vm2, %v2225_v45 }
 0x47f   : > { %4848 = vmatmul.mubr.msk.f32.vlgmr.msra.gmra.mxu0 %vm602_vm1, %v5995_v33  ;;  %4861 = vmatprep.subr.mxu0 %v347_v23 }
 0x480   : > { %4851 = vmatpush3.msra.mxu1 %v963_v31  ;;  %4858 = vmatprep.mubr.msk.f32.mxu1 %vm602_vm1, %v5999_v40 }
 0x481   : > { %4862 = vmatpush3.msra.mxu0 %v347_v23  ;;  %4852 = vmatprep.subr.mxu1 %v958_v49 }
 0x482   : > { %4880 = vmatprep.subr.mxu0 %v5611_v16  ;;  %4853 = vmatpush3.msra.mxu1 %v958_v49 }
 0x483   : > { %4854 = vmatprep.subr.mxu1 %v953_v22 }
 0x484   : > { %4855 = vmatpush3.msra.mxu1 %v953_v22 }
 0x485   : > { %4856 = vmatprep.subr.mxu1 %v948_v59 }
 0x486   : > { %4857 = vmatpush3.msra.mxu1 %v948_v59  ;;  %v6379_v59 = vld [vmem:[#allocation8_spill] sm:$0xff] }
 0x487   : > { %4859 = vmatmul.mubr.msk.f32.vlgmr.msra.gmra.mxu1 %vm602_vm1, %v6010_v54  ;;  %4869 = vmatprep.subr.mxu1 %v5594_v19 }
 0x488   : > { %4870 = vmatpush3.msra.mxu1 %v5594_v19 }
 0x489   : > { %4871 = vmatprep.subr.mxu1 %v6376_v46 }
 0x48a   : > { %4872 = vmatpush3.msra.mxu1 %v6376_v46  ;;  %v6380_v46 = vld [vmem:[#allocation14_spill] sm:$0xff] }
 0x48b   : > { %4873 = vmatprep.subr.mxu1 %v6377_v43 }
 0x48c   : > { %4874 = vmatpush3.msra.mxu1 %v6377_v43  ;;  %v2745_v47 = vpop.xlane.xlu1 %2744  ;;  %v1452_v43 = vadd.f32 %v6380_v46, %v6379_v59 }
 0x48d   : > { %4875 = vmatprep.subr.mxu1 %v6378_v34  ;;  %5029 = vrcp.f32 %v2745_v47 }
 0x48e   : > { %4876 = vmatpush3.msra.mxu1 %v6378_v34  ;;  %v2742_v36 = vpop.xlane.xlu0 %2741 }
 0x48f   : > { %5031 = vrcp.f32 %v2742_v36  ;;  %4891 = vmatprep.subr.mxu1 %v348_v57  ;;  %v6382_v36 = vld [vmem:[#allocation13_spill] sm:$0xff] }
 0x494   : > { %v2751_v53 = vpop.xlane.xlu1 %2750 }
 0x496   : > { %v2748_v11 = vpop.xlane.xlu0 %2747 }
 0x49a   : > { %v5030_v19 = vpop.eup %5029 }
 0x49b   : > { %v6029_v14 = vmul.f32 %v5030_v19, %v5887_v39 }
 0x49c   : > { %v5032_v37 = vpop.eup %5031 }
 0x49d   : > { %v6026_v38 = vmul.f32 %v5032_v37, %v5891_v13 }
 0x49f   : > { %4877 = vmatprep.mubr.msk.f32.mxu1 %vm602_vm1, %v6026_v38 }
 0x4a0   : > { %4878 = vmatmul.mubr.msk.f32.vlgmr.msra.gmra.mxu1 %vm602_vm1, %v6029_v14 }
 0x4a1   : > { %4892 = vmatpush3.msra.mxu1 %v348_v57  ;;  %v6381_v57 = vld [vmem:[#allocation12_spill] sm:$0xff] }
 0x4a2   : > { %4910 = vmatprep.subr.mxu1 %v5781_v60 }
 0x4d8   : > { %v2661_v15 = vpop.xlane.xlu1 %2660 }
 0x4d9   : > { %v2689_v17 = vsub.f32 %v5903_v18, %v2661_v15  ;;  %v6384_v15 = vld [vmem:[#allocation18_spill] sm:$0xff] }
 0x4da   : > { %v2658_v6 = vpop.xlane.xlu0 %2657 }
 0x4db   : > { %v2714_v13 = vmul.f32 1.442695, %v2689_v17  ;;  %v2688_v55 = vsub.f32 %v5907_v63, %v2658_v6  ;;  %v349_v17 = vld [vmem:[%s6347_s3 + $0x10] sm:$0xff]  ;;  %v6386_v6 = vld [vmem:[#allocation16_spill] sm:$0xff] }
 0x4dd   : > { %5033 = vpow2.f32 %v2714_v13  ;;  %v2712_v39 = vmul.f32 1.442695, %v2688_v55  ;;  %v1945_v55 = vadd.f32 %v5912_v12, %v5752_v50 }
 0x4df   : > { %5035 = vpow2.f32 %v2712_v39  ;;  %v6115_v39 = vadd.f32 %v5941_v35, %v5930_v61  ;;  %v3872_v35 = vsel %vm602_vm1, %v6026_v38, 0.0 }
 0x4e0   : > { %v2667_v2 = vpop.xlane.xlu1 %2666 }
 0x4e1   : > { %v2691_v41 = vsub.f32 %v5917_v51, %v2667_v2 }
 0x4e2   : > { %v2664_v1 = vpop.xlane.xlu0 %2663 }
 0x4e3   : > { %v2718_v26 = vmul.f32 1.442695, %v2691_v41  ;;  %v2690_v10 = vsub.f32 %v5921_v56, %v2664_v1 }
 0x4e5   : > { %5037 = vpow2.f32 %v2718_v26  ;;  %v2716_v3 = vmul.f32 1.442695, %v2690_v10  ;;  %v3871_v26 = vsel %vm602_vm1, %v5978_v0, 0.0 }
 0x4e7   : > { %5039 = vpow2.f32 %v2716_v3 }
 0x4e8   : > { %5041 = vrcp.f32 %v2748_v11 }
 0x4e9   : > { %5043 = vrcp.f32 %v2751_v53 }
 0x4ea   : > { %v6040_v27 = vpop.eup %5033 }
 0x4eb   : > { %v2755_v18 = vsel %vm602_vm1, %v6040_v27, 0.0 }
 0x4ec   : > { %v6044_v25 = vpop.eup %5035  ;;  %2756 = vadd.xlane.f32.xlu1 %v2755_v18  ;;  %v3873_v18 = vadd.f32 %v3872_v35, %v3871_v26 }
 0x4ed   : > { %v2752_v63 = vsel %vm602_vm1, %v6044_v25, 0.0 }
 0x4ee   : > { %2753 = vadd.xlane.f32.xlu0 %v2752_v63 }
 0x4f2   : > { %v6048_v51 = vpop.eup %5037 }
 0x4f3   : > { %v2761_v56 = vsel %vm602_vm1, %v6048_v51, 0.0 }
 0x4f4   : > { %v6052_v30 = vpop.eup %5039  ;;  %2762 = vadd.xlane.f32.xlu1 %v2761_v56 }
 0x4f5   : > { %v2758_v42 = vsel %vm602_vm1, %v6052_v30, 0.0  ;;  %v5042_v47 = vpop.eup %5041 }
 0x4f6   : > { %2759 = vadd.xlane.f32.xlu0 %v2758_v42  ;;  %v5044_v37 = vpop.eup %5043  ;;  %v6085_v53 = vmul.f32 %v5042_v47, %v5899_v20  ;;  %v6385_v20 = vld [vmem:[#allocation15_spill] sm:$0xff] }
 0x4f7   : > { %v6092_v11 = vmul.f32 %v5044_v37, %v5895_v21  ;;  %v6164_v37 = vld [vmem:[%s6349_s5] ss:$0 sm:$0xff] }
 0x536   : > { %v6056_v44 = vpop.f32.mrf.mxu0 }
 0x537   : > { %v2671_v58 = vsel %vm602_vm1, %v6056_v44, -inf }
 0x538   : > { %2672 = vmax.xlane.f32.xlu1 %v2671_v58  ;;  %v6060_v24 = vpop.f32.mrf.mxu0 }
 0x539   : > { %v2668_v31 = vsel %vm602_vm1, %v6060_v24, -inf }
 0x53a   : > { %2669 = vmax.xlane.f32.xlu0 %v2668_v31 }
 0x53e   : > { %v6066_v62 = vpop.f32.mrf.mxu1 }
 0x53f   : > { %v4849_v45 = vpop.f32.mrf.mxu0  ;;  %v2677_v23 = vsel %vm602_vm1, %v6066_v62, -inf }
 0x540   : > { %v6070_v49 = vpop.f32.mrf.mxu1  ;;  %2678 = vmax.xlane.f32.xlu1 %v2677_v23 }
 0x541   : > { %v2887_v22 = vpop.f32.mrf.mxu0  ;;  %v2674_v5 = vsel %vm602_vm1, %v6070_v49, -inf }
 0x542   : > { %4863 = vmatprep.mubr.msk.f32.mxu0 %vm966_vm2, %v2887_v22  ;;  %2675 = vmax.xlane.f32.xlu0 %v2674_v5 }
 0x543   : > { %4864 = vmatmul.mubr.msk.f32.vlgmr.msra.gmra.mxu0 %vm966_vm2, %v4849_v45 }
 0x544   : > { %4881 = vmatpush3.msra.mxu0 %v5611_v16  ;;  %v6383_v16 = vld [vmem:[#allocation17_spill] sm:$0xff] }
 0x545   : > { %4882 = vmatprep.subr.mxu0 %v1452_v43 }
 0x546   : > { %4883 = vmatpush3.msra.mxu0 %v1452_v43 }
 0x547   : > { %4884 = vmatprep.subr.mxu0 %v6381_v57  ;;  %v4860_v34 = vpop.f32.mrf.mxu1 }
 0x548   : > { %4885 = vmatpush3.msra.mxu0 %v6381_v57 }
 0x549   : > { %4886 = vmatprep.subr.mxu0 %v6382_v36  ;;  %v2968_v19 = vpop.f32.mrf.mxu1 }
 0x54a   : > { %4887 = vmatpush3.msra.mxu0 %v6382_v36  ;;  %4866 = vmatprep.mubr.msk.f32.mxu0 %vm966_vm2, %v2968_v19 }
 0x54b   : > { %4899 = vmatprep.subr.mxu0 %v6383_v16  ;;  %4867 = vmatmul.mubr.msk.f32.gmra.mxu0 %vm966_vm2, %v4860_v34 }
 0x54c   : > { %4888 = vmatprep.mubr.msk.f32.mxu0 %vm602_vm1, %v6085_v53 }
 0x54f   : > { %4889 = vmatmul.mubr.msk.f32.vlgmr.msra.gmra.mxu0 %vm602_vm1, %v6092_v11 }
 0x550   : > { %4900 = vmatpush3.msra.mxu0 %v6383_v16 }
 0x551   : > { %4901 = vmatprep.subr.mxu0 %v6384_v15 }
 0x552   : > { %4902 = vmatpush3.msra.mxu0 %v6384_v15 }
 0x553   : > { %4903 = vmatprep.subr.mxu0 %v6385_v20 }
 0x554   : > { %4904 = vmatpush3.msra.mxu0 %v6385_v20 }
 0x555   : > { %4905 = vmatprep.subr.mxu0 %v6386_v6 }
 0x556   : > { %4906 = vmatpush3.msra.mxu0 %v6386_v6 }
 0x557   : > { %4921 = vmatprep.subr.mxu0 %v349_v17 }
 0x560   : > { %v4879_v21 = vpop.f32.mrf.mxu1 }
 0x562   : > { %v3150_v13 = vpop.f32.mrf.mxu1 }
 0x563   : > { %4893 = vmatprep.mubr.msk.f32.mxu1 %vm966_vm2, %v3150_v13 }
 0x564   : > { %4894 = vmatmul.mubr.msk.f32.vlgmr.msra.gmra.mxu1 %vm966_vm2, %v4879_v21 }
 0x565   : > { %4911 = vmatpush3.msra.mxu1 %v5781_v60  ;;  %v3879_v60 = vsel %vm602_vm1, %v6029_v14, 0.0 }
 0x566   : > { %4912 = vmatprep.subr.mxu1 %v1945_v55 }
 0x567   : > { %4913 = vmatpush3.msra.mxu1 %v1945_v55 }
 0x568   : > { %4914 = vmatprep.subr.mxu1 %v5773_v7 }
 0x569   : > { %4915 = vmatpush3.msra.mxu1 %v5773_v7  ;;  %v3878_v7 = vsel %vm602_vm1, %v5995_v33, 0.0 }
 0x56a   : > { %4916 = vmatprep.subr.mxu1 %v5776_v48 }
 0x56b   : > { %4917 = vmatpush3.msra.mxu1 %v5776_v48  ;;  %v3880_v48 = vadd.f32 %v3879_v60, %v3878_v7 }
 0x56c   : > { %4929 = vmatprep.subr.mxu1 %v6115_v39 }
 0x575   : > { %v2757_v50 = vpop.xlane.xlu1 %2756 }
 0x576   : > { %5045 = vrcp.f32 %v2757_v50 }
 0x577   : > { %v2754_v12 = vpop.xlane.xlu0 %2753 }
 0x578   : > { %5047 = vrcp.f32 %v2754_v12 }
 0x57d   : > { %v2763_v38 = vpop.xlane.xlu1 %2762 }
 0x57f   : > { %v2760_v0 = vpop.xlane.xlu0 %2759 }
 0x583   : > { %v5046_v2 = vpop.eup %5045 }
 0x584   : > { %v2801_v41 = vmul.f32 %v5046_v2, %v6040_v27 }
 0x585   : > { %v5048_v1 = vpop.eup %5047 }
 0x586   : > { %v2800_v10 = vmul.f32 %v5048_v1, %v6044_v25  ;;  %v3881_v3 = vsel %vm602_vm1, %v2801_v41, 0.0  ;;  %v3893_v1 = vsel %vm602_vm1, %v6092_v11, 0.0 }
 0x587   : > { %v6131_v14 = vadd.f32 %v3881_v3, %v3880_v48  ;;  %v3892_v3 = vsel %vm602_vm1, %v6010_v54, 0.0 }
 0x588   : > { %4907 = vmatprep.mubr.msk.f32.mxu0 %vm602_vm1, %v2800_v10  ;;  %v3874_v33 = vsel %vm602_vm1, %v2800_v10, 0.0 }
 0x589   : > { %v6135_v63 = vadd.f32 %v3874_v33, %v3873_v18  ;;  %4908 = vmatmul.mubr.msk.f32.vlgmr.msra.gmra.mxu0 %vm602_vm1, %v2801_v41  ;;  %v3886_v18 = vsel %vm602_vm1, %v6085_v53, 0.0 }
 0x58a   : > { %4922 = vmatpush3.msra.mxu0 %v349_v17 }
 0x58b   : > { %4940 = vmatprep.subr.mxu0 %v5960_v9 }
 0x5c1   : > { %v2673_v27 = vpop.xlane.xlu1 %2672 }
 0x5c2   : > { %v2693_v25 = vsub.f32 %v6056_v44, %v2673_v27 }
 0x5c3   : > { %v2670_v56 = vpop.xlane.xlu0 %2669 }
 0x5c4   : > { %v2722_v42 = vmul.f32 1.442695, %v2693_v25  ;;  %v2692_v58 = vsub.f32 %v6060_v24, %v2670_v56 }
 0x5c6   : > { %5049 = vpow2.f32 %v2722_v42  ;;  %v2720_v31 = vmul.f32 1.442695, %v2692_v58 }
 0x5c8   : > { %5051 = vpow2.f32 %v2720_v31 }
 0x5c9   : > { %v2679_v45 = vpop.xlane.xlu1 %2678 }
 0x5ca   : > { %v2695_v23 = vsub.f32 %v6066_v62, %v2679_v45 }
 0x5cb   : > { %v2676_v22 = vpop.xlane.xlu0 %2675 }
 0x5cc   : > { %v2726_v5 = vmul.f32 1.442695, %v2695_v23  ;;  %v2694_v59 = vsub.f32 %v6070_v49, %v2676_v22 }
 0x5ce   : > { %5053 = vpow2.f32 %v2726_v5  ;;  %v2724_v46 = vmul.f32 1.442695, %v2694_v59  ;;  %v350_v5 = vld [vmem:[%s6347_s3 + $0x18] sm:$0xff] }
 0x5d0   : > { %5055 = vpow2.f32 %v2724_v46 }
 0x5d1   : > { %5057 = vrcp.f32 %v2760_v0 }
 0x5d2   : > { %5059 = vrcp.f32 %v2763_v38  ;;  %v3894_v38 = vadd.f32 %v3893_v1, %v3892_v3 }
 0x5d3   : > { %v6143_v43 = vpop.eup %5049 }
 0x5d4   : > { %v2767_v44 = vsel %vm602_vm1, %v6143_v43, 0.0 }
 0x5d5   : > { %v6147_v47 = vpop.eup %5051  ;;  %2768 = vadd.xlane.f32.xlu1 %v2767_v44 }
 0x5d6   : > { %v2764_v24 = vsel %vm602_vm1, %v6147_v47, 0.0 }
 0x5d7   : > { %2765 = vadd.xlane.f32.xlu0 %v2764_v24 }
 0x5db   : > { %v6151_v62 = vpop.eup %5053 }
 0x5dc   : > { %v2773_v49 = vsel %vm602_vm1, %v6151_v62, 0.0 }
 0x5dd   : > { %v6155_v57 = vpop.eup %5055  ;;  %2774 = vadd.xlane.f32.xlu1 %v2773_v49 }
 0x5de   : > { %v2770_v34 = vsel %vm602_vm1, %v6155_v57, 0.0  ;;  %v5058_v6 = vpop.eup %5057 }
 0x5df   : > { %2771 = vadd.xlane.f32.xlu0 %v2770_v34  ;;  %v5060_v55 = vpop.eup %5059  ;;  %v2802_v50 = vmul.f32 %v5058_v6, %v6052_v30 }
 0x5e0   : > { %v2803_v12 = vmul.f32 %v5060_v55, %v6048_v51 }
 0x5e1   : > { %v3888_v54 = vsel %vm602_vm1, %v2802_v50, 0.0 }
 0x603   : > { %v4865_v36 = vpop.f32.mrf.mxu0 }
 0x604   : > { %v3075_v30 = vadd.f32 %v4865_v36, %v6164_v37 }
 0x605   : > { %v6159_v19 = vpop.f32.mrf.mxu0 }
 0x60b   : > { %v4868_v16 = vpop.f32.mrf.mxu0 }
 0x60c   : > { %v6167_v15 = vadd.f32 %v4868_v16, %v6164_v37 }
 0x60d   : > { %v3065_v20 = vpop.f32.mrf.mxu0 }
 0x60e   : > { %v6170_v17 = vadd.f32 %v6164_v37, %v3065_v20 }
 0x60f   : > { %v4890_v21 = vpop.f32.mrf.mxu0 }
 0x611   : > { %v3231_v13 = vpop.f32.mrf.mxu0 }
 0x612   : > { %4896 = vmatprep.mubr.msk.f32.mxu1 %vm966_vm2, %v3231_v13 }
 0x613   : > { %4897 = vmatmul.mubr.msk.f32.gmra.mxu1 %vm966_vm2, %v4890_v21 }
 0x614   : > { %4918 = vmatprep.mubr.msk.f32.mxu1 %vm602_vm1, %v2802_v50 }
 0x617   : > { %4919 = vmatmul.mubr.msk.f32.vlgmr.msra.gmra.mxu1 %vm602_vm1, %v2803_v12 }
 0x618   : > { %4930 = vmatpush3.msra.mxu1 %v6115_v39 }
 0x619   : > { %4931 = vmatprep.subr.mxu1 %v5946_v8 }
 0x61a   : > { %4932 = vmatpush3.msra.mxu1 %v5946_v8  ;;  %v2438_v8 = vadd.f32 %v6064_v32, %v5930_v61 }
 0x61b   : > { %4933 = vmatprep.subr.mxu1 %v5935_v28 }
 0x61c   : > { %4934 = vmatpush3.msra.mxu1 %v5935_v28 }
 0x61d   : > { %4935 = vmatprep.subr.mxu1 %v5939_v29 }
 0x61e   : > { %4936 = vmatpush3.msra.mxu1 %v5939_v29 }
 0x61f   : > { %4951 = vmatprep.subr.mxu1 %v350_v5 }
 0x624   : > { %v4895_v60 = vpop.f32.mrf.mxu1 }
 0x625   : > { %v6186_v51 = vadd.f32 %v4895_v60, %v3075_v30 }
 0x626   : > { %v3318_v59 = vpop.f32.mrf.mxu1 }
 0x649   : > { %v4909_v2 = vpop.f32.mrf.mxu0 }
 0x64b   : > { %v3413_v7 = vpop.f32.mrf.mxu0 }
 0x64c   : > { %4923 = vmatprep.mubr.msk.f32.mxu0 %vm966_vm2, %v3413_v7 }
 0x64d   : > { %4924 = vmatmul.mubr.msk.f32.vlgmr.msra.gmra.mxu0 %vm966_vm2, %v4909_v2 }
 0x64e   : > { %4941 = vmatpush3.msra.mxu0 %v5960_v9 }
 0x64f   : > { %4942 = vmatprep.subr.mxu0 %v2438_v8 }
 0x650   : > { %4943 = vmatpush3.msra.mxu0 %v2438_v8 }
 0x651   : > { %4944 = vmatprep.subr.mxu0 %v5951_v52 }
 0x652   : > { %4945 = vmatpush3.msra.mxu0 %v5951_v52 }
 0x653   : > { %4946 = vmatprep.subr.mxu0 %v5954_v4 }
 0x654   : > { %4947 = vmatpush3.msra.mxu0 %v5954_v4 }
 0x65e   : > { %v2769_v28 = vpop.xlane.xlu1 %2768 }
 0x65f   : > { %5061 = vrcp.f32 %v2769_v28 }
 0x660   : > { %v2766_v29 = vpop.xlane.xlu0 %2765 }
 0x661   : > { %5063 = vrcp.f32 %v2766_v29 }
 0x666   : > { %v2775_v61 = vpop.xlane.xlu1 %2774 }
 0x667   : > { %5065 = vrcp.f32 %v2775_v61 }
 0x668   : > { %v2772_v32 = vpop.xlane.xlu0 %2771 }
 0x669   : > { %5067 = vrcp.f32 %v2772_v32 }
 0x66c   : > { %v5062_v9 = vpop.eup %5061 }
 0x66d   : > { %v2805_v39 = vmul.f32 %v5062_v9, %v6143_v43 }
 0x66e   : > { %v5064_v35 = vpop.eup %5063 }
 0x66f   : > { %v2804_v52 = vmul.f32 %v5064_v35, %v6147_v47  ;;  %v3883_v4 = vsel %vm602_vm1, %v2805_v39, 0.0 }
 0x670   : > { %v3884_v41 = vadd.f32 %v3883_v4, %v6131_v14  ;;  %v3895_v14 = vsel %vm602_vm1, %v2803_v12, 0.0 }
 0x671   : > { %4937 = vmatprep.mubr.msk.f32.mxu1 %vm602_vm1, %v2804_v52  ;;  %v3876_v48 = vsel %vm602_vm1, %v2804_v52, 0.0  ;;  %v3896_v25 = vadd.f32 %v3895_v14, %v3894_v38 }
 0x672   : > { %v3877_v26 = vadd.f32 %v3876_v48, %v6135_v63  ;;  %4938 = vmatmul.mubr.msk.f32.vlgmr.msra.gmra.mxu1 %vm602_vm1, %v2805_v39  ;;  %v3900_v10 = vmul.f32 0.25, %v3884_v41  ;;  %v3885_v63 = vsel %vm602_vm1, %v5999_v40, 0.0 }
 0x673   : > { %v3887_v27 = vadd.f32 %v3886_v18, %v3885_v63  ;;  %4952 = vmatpush3.msra.mxu1 %v350_v5 }
 0x674   : > { %v5066_v33 = vpop.eup %5065  ;;  %v3899_v11 = vmul.f32 0.25, %v3877_v26  ;;  %3904 = vst.msk [vmem:[%s6218_s20 + $0x8] sm:$0xff] %vm602_vm1, %v3900_v10 }
 0x675   : > { %v2807_v53 = vmul.f32 %v5066_v33, %v6151_v62  ;;  %v3889_v58 = vadd.f32 %v3888_v54, %v3887_v27 }
 0x676   : > { %v5068_v0 = vpop.eup %5067  ;;  %3903 = vst.msk [vmem:[%s6218_s20] sm:$0xff] %vm602_vm1, %v3899_v11 }
 0x677   : > { %v3897_v56 = vsel %vm602_vm1, %v2807_v53, 0.0  ;;  %v2806_v42 = vmul.f32 %v5068_v0, %v6155_v57 }
 0x678   : > { %v3898_v31 = vadd.f32 %v3897_v56, %v3896_v25 }
 0x679   : > { %v3890_v45 = vsel %vm602_vm1, %v2806_v42, 0.0 }
 0x67a   : > { %v3902_v23 = vmul.f32 0.25, %v3898_v31  ;;  %v3891_v40 = vadd.f32 %v3890_v45, %v3889_v58 }
 0x67c   : > { %v3901_v22 = vmul.f32 0.25, %v3891_v40  ;;  %3906 = vst.msk [vmem:[%s6218_s20 + $0x18] sm:$0xff] %vm602_vm1, %v3902_v23 }
 0x67e   : > { %3905 = vst.msk [vmem:[%s6218_s20 + $0x10] sm:$0xff] %vm602_vm1, %v3901_v22  ;;  %s5075_s20 = scalar_lea.vmem %s5074_s17, 1024 }
 0x67f   : > { %p5077_p1 = scmp.lt.s32.totalorder %s5075_s20, %s5069_s15 }
 0x681   : > { %p5078_p2 = por %p5077_p1, %p5076_p0 }
 0x683   : > { %p5079_p3 = pnand %p5078_p2, %p5072_p13 }
 0x6d3   : > { %v4898_v46 = vpop.f32.mrf.mxu1 }
 0x6d4   : > { %v3340_v43 = vadd.f32 %v4898_v46, %v6167_v15 }
 0x6d5   : > { %v3328_v44 = vpop.f32.mrf.mxu1 }
 0x6d6   : > { %v3339_v47 = vadd.f32 %v3328_v44, %v6170_v17 }
 0x6d7   : > { %v4920_v24 = vpop.f32.mrf.mxu1 }
 0x6d9   : > { %v3494_v62 = vpop.f32.mrf.mxu1 }
 0x6da   : > { %4926 = vmatprep.mubr.msk.f32.mxu0 %vm966_vm2, %v3494_v62 }
 0x6db   : > { %4927 = vmatmul.mubr.msk.f32.gmra.mxu0 %vm966_vm2, %v4920_v24 }
 0x6dc   : > { %4948 = vmatprep.mubr.msk.f32.mxu0 %vm602_vm1, %v2806_v42 }
 0x6df   : > { %4949 = vmatmul.mubr.msk.f32.vlgmr.msra.gmra.mxu0 %vm602_vm1, %v2807_v53 }
 0x70d   : > { %v4925_v49 = vpop.f32.mrf.mxu0 }
 0x70e   : > { %v3601_v57 = vadd.f32 %v4925_v49, %v6186_v51 }
 0x70f   : > { %v3581_v16 = vpop.f32.mrf.mxu0 }
 0x732   : > { %v4939_v34 = vpop.f32.mrf.mxu1 }
 0x734   : > { %v3676_v36 = vpop.f32.mrf.mxu1 }
 0x735   : > { %4953 = vmatprep.mubr.msk.f32.mxu1 %vm966_vm2, %v3676_v36 }
 0x736   : > { %4954 = vmatmul.mubr.msk.f32.vlgmr.msra.gmra.mxu1 %vm966_vm2, %v4939_v34 }
 0x79b   : > { %v4928_v15 = vpop.f32.mrf.mxu0 }
 0x79c   : > { %v3603_v20 = vadd.f32 %v4928_v15, %v3340_v43 }
 0x79d   : > { %v3591_v17 = vpop.f32.mrf.mxu0 }
 0x79e   : > { %v3602_v6 = vadd.f32 %v3591_v17, %v3339_v47 }
 0x79f   : > { %v4950_v21 = vpop.f32.mrf.mxu0 }
 0x7a1   : > { %v3757_v13 = vpop.f32.mrf.mxu0 }
 0x7a2   : > { %4956 = vmatprep.mubr.msk.f32.mxu1 %vm966_vm2, %v3757_v13 }
 0x7a3   : > { %4957 = vmatmul.mubr.msk.f32.gmra.mxu1 %vm966_vm2, %v4950_v21 }
 0x7a4   : > { %5082 = shalt.err (!%p5079_p3)
}
 0x7a5   : > { %s5083_s21 = scalar_lea.hbm %s6256_s13, 512  ;;  %s5087_s9 = scalar_lea.hbm %s6351_s7, 1024 }
 0x7a6   : > { %p5084_p4 = scmp.ne.s32.totalorder %s6256_s13, %s5083_s21  ;;  %p5088_p9 = scmp.lt.s32.totalorder %s6256_s13, %s6351_s7 }
 0x7a7   : > { %p5089_p10 = scmp.lt.s32.totalorder %s5087_s9, %s5083_s21 }
 0x7a8   : > { %p5085_p7 = pnand %p5084_p4, %p5243_p5 }
 0x7a9   : > { %p5090_p11 = por %p5089_p10, %p5088_p9 }
 0x7aa   : > { %p5086_p8 = pneg %p5085_p7 }
 0x7ac   : > { %p5091_p12 = pnand %p5090_p11, %p5086_p8 }
 0x7ae   : > { %5094 = shalt.err (!%p5091_p12)
}
 0x7af   : > { %s5162_s15 = smov 128   ;;  %s5163_s17 = smov 8   ;;  %v3074_v55 = vadd.f32 %v6164_v37, %v6159_v19 }
 0x7b0   : > { %4960 = dma.vmem_to_hbm [thread:$0]  (%p5243_p5), %s6258_s23, 512, %s6256_s13, %s3913_s14, %s5162_s15, %s5162_s15, %s5163_s17  }
 0x7b1   : > { %v3337_v50 = vadd.f32 %v3318_v59, %v3074_v55  ;;  %s278_s29 = scalar_lea.vmem [#allocation2], %s4042_s19  ;;  %s6387_s23 = sshll.u32 %s5226_s28, 9 }
 0x7b2   : > { %s3927_s20 = sshll.u32 %s278_s29, 4  ;;  %s6300_s14 = scalar_lea.hbm %s6350_s6, %s6387_s23  ;;  %s6292_s20 = int_to_ptr.vmem [resolvable:$true] %s3927_s20 }
 0x7b3   : > { %v3600_v30 = vadd.f32 %v3581_v16, %v3337_v50  ;;  %s3908_s21 = scalar_lea.sflag [#allocation3], %s6198_s18  ;;  %s5095_s22 = scalar_lea.vmem %s6292_s20, 512 }
 0x7b4   : > { %p5096_p13 = scmp.ne.s32.totalorder %s6292_s20, %s5095_s22  ;;  %s5164_s8 = smov [#allocation2]  }
 0x7b5   : > { %s5099_s9 = sshll.u32 %s5164_s8, 4  ;;  %s5100_s9 = int_to_ptr.vmem [resolvable:$false] %s5099_s9 }
 0x7b6   : > { %p5097_p0 = pnand %p5096_p13, %p5243_p5  ;;  %s5101_s16 = scalar_lea.vmem %s5100_s9, 1024 }
 0x7b7   : > { %p5102_p2 = scmp.lt.s32.totalorder %s6292_s20, %s5100_s9  ;;  %p5103_p3 = scmp.lt.s32.totalorder %s5101_s16, %s5095_s22 }
 0x7b8   : > { %p5098_p1 = pneg %p5097_p0 }
 0x7b9   : > { %p5104_p4 = por %p5103_p3, %p5102_p2 }
 0x7bb   : > { %p5105_p7 = pnand %p5104_p4, %p5098_p1 }
 0x7f6   : > { %v4955_v12 = vpop.f32.mrf.mxu1 }
 0x7f7   : > { %v3864_v60 = vadd.f32 %v4955_v12, %v3601_v57 }
 0x7f8   : > { %v3844_v51 = vpop.f32.mrf.mxu1 }
 0x7f9   : > { %3868 = vst.msk [vmem:[%s278_s29 + $0x8] sm:$0xff] %vm602_vm1, %v3864_v60  ;;  %v3863_v2 = vadd.f32 %v3844_v51, %v3600_v30 }
 0x7fb   : > { %3867 = vst.msk [vmem:[%s278_s29] sm:$0xff] %vm602_vm1, %v3863_v2 }
 0x863   : > { %v4958_v7 = vpop.f32.mrf.mxu1 }
 0x864   : > { %v3866_v8 = vadd.f32 %v4958_v7, %v3603_v20 }
 0x865   : > { %v3854_v28 = vpop.f32.mrf.mxu1 }
 0x866   : > { %3870 = vst.msk [vmem:[%s278_s29 + $0x18] sm:$0xff] %vm602_vm1, %v3866_v8  ;;  %v3865_v19 = vadd.f32 %v3854_v28, %v3602_v6 }
 0x868   : > { %3869 = vst.msk [vmem:[%s278_s29 + $0x10] sm:$0xff] %vm602_vm1, %v3865_v19 }
 0x869   : > { %5108 = shalt.err (!%p5105_p7)
}
 0x86a   : > { %s5109_s28 = scalar_lea.hbm %s6300_s14, 512  ;;  %s5113_s23 = scalar_lea.hbm %s6350_s6, 1024 }
 0x86b   : > { %p5110_p8 = scmp.ne.s32.totalorder %s6300_s14, %s5109_s28  ;;  %p5114_p11 = scmp.lt.s32.totalorder %s6300_s14, %s6350_s6 }
 0x86c   : > { %p5115_p12 = scmp.lt.s32.totalorder %s5113_s23, %s5109_s28 }
 0x86d   : > { %p5111_p9 = pnand %p5110_p8, %p5243_p5 }
 0x86e   : > { %p5116_p13 = por %p5115_p12, %p5114_p11 }
 0x86f   : > { %p5112_p10 = pneg %p5111_p9 }
 0x871   : > { %p5117_p0 = pnand %p5116_p13, %p5112_p10 }
 0x873   : > { %5120 = shalt.err (!%p5117_p0)
}
 0x874   : > { %4959 = dma.vmem_to_hbm [thread:$0]  (%p5243_p5), %s6292_s20, 512, %s6300_s14, %s3908_s21, %s5162_s15, %s5162_s15, %s5163_s17  }
 0x875 PF: > { %p4970_p1 = scmp.ge.s32.totalorder %s5159_s27, 2  ;;  %s3959_s22 = sand.u32 1, %s5147_s24  }
 0x876   : > { %s3960_s8 = scalar_lea.sflag [#allocation3], %s3959_s22 }
 0x877   : > { %p4964_p2 = pnand %p4970_p1, %p5247_p6 }
 0x879   : > { %p4965_p3 = pneg %p4964_p2 }
 0x87b   : > { %5138 = dma.done.wait (%p4965_p3), %s3960_s8, 512  }
 0x87c   : > { %5140 = vsyncadd (%p4965_p3), %s3960_s8, 4294966784  ;;  %s3969_s9 = scalar_lea.sflag [#allocation5], %s3959_s22 }
 0x87d   : > { %5142 = dma.done.wait (%p4965_p3), %s3969_s9, 512  }
 0x87e   : > { %5144 = vsyncadd (%p4965_p3), %s3969_s9, 4294966784  ;;  %p21_p5 = scmp.ge.s32.totalorder %s5230_s30, 4   ;;  %s6388_s24 = smov %s5151_s25 }
 0x87f   : > { %s6389_s25 = smov %s5155_s26  ;;  %s6390_s26 = smov %s5241_s10 }
 0x880   : > { %s6391_s27 = smov %s5230_s30  ;;  %23 = sbr.rel (!%p21_p5) target bundleno = 5 (0x5), region = 96 }
 0x885   :  { %3974 = vsyncpa [#allocation3], 1 }
 0x886   :  { %3976 = vsyncpa [#allocation3 + $0x1], 1 }
 0x887   :  { %3977 = vsyncpa [#allocation5], 1 }
 0x888   :  { %3979 = vsyncpa [#allocation5 + $0x1], 1 }

</bundles_post_ra>
